<compile_context>
chip_gen: v6e
topology: v6e:2x2x1
jax: 0.10.0
libtpu: 0.0.40
codegen_flags: <defaults>
</compile_context>

<pallas_src>
import math

import jax
import jax.numpy as jnp
import numpy as np
from jax.experimental import pallas as pl
from jax.experimental.pallas import tpu as pltpu

_EPS = 1e-5


# ----------------------------------------------------------------------------
# Fused Pallas kernel: all layers of the SSMModel for one batch element.
# ----------------------------------------------------------------------------
def ssm_model_kernel(
    x_ref,                       # (L, F)
    w_in_ref, b_in_ref,          # (NL, F, Fi), (NL, 1, Fi)
    conv_w_ref, conv_b_ref,      # (NL, 3*Fi, Fi), (NL, 1, Fi)
    a_flat_ref, d_ref,           # (NL, 1, S*Fi)  [= exp(A_log).T flattened], (NL, 1, Fi)
    w_bcd_ref, b_bcd_ref,        # (NL, Fi, 2S+nd), (NL, 1, 2S+nd)   [B|C|Delta1 fused]
    wD2_ref, bD2_ref,            # (NL, nd, Fi), (NL, 1, Fi)
    w_out_ref, b_out_ref,        # (NL, Fi, F), (NL, 1, F)
    o_ref,                       # (L, F)
):
    n_layers = w_in_ref.shape[0]
    Fi = w_in_ref.shape[2]
    SFi = a_flat_ref.shape[2]
    S = SFi // Fi

    x = x_ref[...].astype(jnp.float32)                # (L, F)
    L = x.shape[0]

    for l in range(n_layers):                          # layers fused in one call
        # ---- project_in: GroupNorm(1, F, affine=False) over whole slab, Linear
        mu = jnp.mean(x)
        var = jnp.mean((x - mu) ** 2)
        xn = (x - mu) * jax.lax.rsqrt(var + _EPS)
        h0 = jnp.dot(xn, w_in_ref[l], preferred_element_type=jnp.float32) + b_in_ref[l]

        # ---- conv_block: Conv1d(k=3, pad=1) folded into one K=3*Fi matmul
        zrow = jnp.zeros((1, Fi), jnp.float32)
        h_prev = jnp.concatenate([zrow, h0[:-1, :]], axis=0)      # h[t-1]
        h_next = jnp.concatenate([h0[1:, :], zrow], axis=0)       # h[t+1]
        slab = jnp.concatenate([h_prev, h0, h_next], axis=1)      # (L, 3*Fi)
        hc = (jnp.dot(slab, conv_w_ref[l], preferred_element_type=jnp.float32)
              + conv_b_ref[l])
        # InstanceNorm1d over L per channel (biased var)
        cmu = jnp.mean(hc, axis=0, keepdims=True)
        cvar = jnp.mean((hc - cmu) ** 2, axis=0, keepdims=True)
        hc = (hc - cmu) * jax.lax.rsqrt(cvar + _EPS)
        hc = hc * jax.nn.sigmoid(hc)                               # SiLU

        # ---- SSM projections: B, C, Delta-stage-1 fused into one matmul
        proj = (jnp.dot(hc, w_bcd_ref[l], preferred_element_type=jnp.float32)
                + b_bcd_ref[l])                                    # (L, 2S+nd)
        Bm = proj[:, 0:S]                                          # (L, S)
        Cm = proj[:, S:2 * S]                                      # (L, S)
        d1 = proj[:, 2 * S:]                                       # (L, nd)
        Delta = jax.nn.softplus(
            jnp.dot(d1, wD2_ref[l], preferred_element_type=jnp.float32) + bD2_ref[l])  # (L, Fi)

        # ---- scan coefficients, lane-dense (L, S*Fi):
        #   a[t, s*Fi+f] = exp(-Delta[t,f] * A[f,s])
        #   b[t, s*Fi+f] = Delta[t,f] * hc[t,f] * Bm[t,s]
        delta_rep = jnp.concatenate([Delta] * S, axis=1)           # (L, S*Fi)
        a = jnp.exp(-delta_rep * a_flat_ref[l])                    # one wide EUP exp
        dth = Delta * hc                                           # (L, Fi)
        b = jnp.concatenate(
            [dth * Bm[:, s:s + 1] for s in range(S)], axis=1)      # (L, S*Fi)

        # ---- Hillis–Steele parallel scan over time (log2(L) wide VPU steps):
        #   s_t = a_t * s_{t-1} + b_t, s_{-1} = 0
        d = 1
        while d < L:
            a_sh = jnp.concatenate(
                [jnp.ones((d, SFi), jnp.float32), a[:L - d, :]], axis=0)
            b_sh = jnp.concatenate(
                [jnp.zeros((d, SFi), jnp.float32), b[:L - d, :]], axis=0)
            b = a * b_sh + b
            a = a * a_sh
            d *= 2
        states = b                                                 # (L, S*Fi)

        # ---- y[t,f] = sum_s C[t,s]*state[t,s,f] + D*hc  (VPU reduce, no matmuls)
        y = states[:, 0:Fi] * Cm[:, 0:1]
        for s in range(1, S):
            y = y + states[:, s * Fi:(s + 1) * Fi] * Cm[:, s:s + 1]
        y = y + d_ref[l] * hc

        # ---- gate, project_out (per-token InstanceNorm over features), residual
        h = y * (h0 * jax.nn.sigmoid(h0))
        pmu = jnp.mean(h, axis=1, keepdims=True)
        pvar = jnp.mean((h - pmu) ** 2, axis=1, keepdims=True)
        hn = (h - pmu) * jax.lax.rsqrt(pvar + _EPS)
        x = (jnp.dot(hn, w_out_ref[l], preferred_element_type=jnp.float32)
             + b_out_ref[l] + x)

    o_ref[...] = x.astype(o_ref.dtype)


# ----------------------------------------------------------------------------
# Wrapper: single pallas_call for the whole model; grid iterates over batch.
# ----------------------------------------------------------------------------
def ssm_model_pallas(x, packed_params):
    B, L, F = x.shape

    def param_spec(p):
        ndim = p.ndim
        return pl.BlockSpec(p.shape, lambda b, _n=ndim: (0,) * _n)

    in_specs = [pl.BlockSpec((None, L, F), lambda b: (b, 0, 0))]
    in_specs += [param_spec(p) for p in packed_params]

    return pl.pallas_call(
        ssm_model_kernel,
        out_shape=jax.ShapeDtypeStruct((B, L, F), x.dtype),
        grid=(B,),
        in_specs=in_specs,
        out_specs=pl.BlockSpec((None, L, F), lambda b: (b, 0, 0)),
        compiler_params=pltpu.CompilerParams(dimension_semantics=("parallel",)),
    )(x, *packed_params)


# ----------------------------------------------------------------------------
# Parameter init (shapes from SSMBlock.__init__) and kernel-layout packing.
# ----------------------------------------------------------------------------
def init_block_params(key, n_features, n_states, expansion):
    Fi = int(n_features * expansion)
    nd = math.ceil(n_features / 16)
    ks = jax.random.split(key, 8)

    def lin(k, fan_in, fan_out):
        kw, kb = jax.random.split(k)
        bound = 1.0 / math.sqrt(fan_in)
        W = jax.random.uniform(kw, (fan_in, fan_out), jnp.float32, -bound, bound)
        b = jax.random.uniform(kb, (1, fan_out), jnp.float32, -bound, bound)
        return W, b

    w_in, b_in = lin(ks[0], n_features, Fi)
    cbound = 1.0 / math.sqrt(Fi * 3)
    conv_w = jax.random.uniform(ks[1], (3, Fi, Fi), jnp.float32, -cbound, cbound)  # [k, in, out]
    conv_b = jax.random.uniform(ks[2], (1, Fi), jnp.float32, -cbound, cbound)
    A_log = jnp.tile(jnp.log(jnp.arange(1, n_states + 1, dtype=jnp.float32))[None, :], (Fi, 1))
    D = jnp.ones((1, Fi), jnp.float32)
    wB, bB = lin(ks[3], Fi, n_states)
    wC, bC = lin(ks[4], Fi, n_states)
    wD1, bD1 = lin(ks[5], Fi, nd)
    wD2, bD2 = lin(ks[6], nd, Fi)
    w_out, b_out = lin(ks[7], Fi, n_features)
    return (w_in, b_in, conv_w, conv_b, A_log, D,
            wB, bB, wC, bC, wD1, bD1, wD2, bD2, w_out, b_out)


def pack_params(layer_params):
    """Stack per-layer params with a leading n_layers axis and hoist
    parameter-only work (conv-weight fold, exp(A_log) transpose/flatten,
    B/C/Delta1 projection fusion) out of the kernel."""
    cols = [list(t) for t in zip(*layer_params)]
    (w_in, b_in, conv_w, conv_b, A_log, D,
     wB, bB, wC, bC, wD1, bD1, wD2, bD2, w_out, b_out) = cols

    def stk(xs):
        return jnp.stack(xs, axis=0)

    conv_w_flat = [cw.reshape(-1, cw.shape[-1]) for cw in conv_w]        # (3*Fi, Fi)
    a_flat = [jnp.exp(al).T.reshape(1, -1) for al in A_log]              # (1, S*Fi)
    w_bcd = [jnp.concatenate([wb, wc, wd1], axis=1)
             for wb, wc, wd1 in zip(wB, wC, wD1)]                        # (Fi, 2S+nd)
    b_bcd = [jnp.concatenate([bb, bc, bd1], axis=1)
             for bb, bc, bd1 in zip(bB, bC, bD1)]                        # (1, 2S+nd)
    return (stk(w_in), stk(b_in), stk(conv_w_flat), stk(conv_b),
            stk(a_flat), stk(D), stk(w_bcd), stk(b_bcd),
            stk(wD2), stk(bD2), stk(w_out), stk(b_out))


# ----------------------------------------------------------------------------
# Pure-JAX reference (mirrors the PyTorch forward) for a correctness check.
# ----------------------------------------------------------------------------
def ssm_block_ref(x, params):
    (w_in, b_in, conv_w, conv_b, A_log, D,
     wB, bB, wC, bC, wD1, bD1, wD2, bD2, w_out, b_out) = params
    x0 = x
    mu = jnp.mean(x, axis=(1, 2), keepdims=True)
    var = jnp.mean((x - mu) ** 2, axis=(1, 2), keepdims=True)
    xn = (x - mu) / jnp.sqrt(var + _EPS)
    h0 = xn @ w_in + b_in
    hp = jnp.pad(h0, ((0, 0), (1, 1), (0, 0)))
    hc = hp[:, :-2] @ conv_w[0] + hp[:, 1:-1] @ conv_w[1] + hp[:, 2:] @ conv_w[2] + conv_b
    cmu = jnp.mean(hc, axis=1, keepdims=True)
    cvar = jnp.mean((hc - cmu) ** 2, axis=1, keepdims=True)
    hc = (hc - cmu) / jnp.sqrt(cvar + _EPS)
    hc = hc * jax.nn.sigmoid(hc)
    A = jnp.exp(A_log)
    Bm = hc @ wB + bB
    Cm = hc @ wC + bC
    Delta = jax.nn.softplus((hc @ wD1 + bD1) @ wD2 + bD2)
    A_bar = jnp.exp(-Delta[..., None] * A)
    BX = Delta[..., None] * Bm[:, :, None, :] * hc[..., None]

    def step(state, inp):
        a, bx = inp
        state = a * state + bx
        return state, state

    def scan_one(a_b, bx_b):
        Fi_, S_ = a_b.shape[1], a_b.shape[2]
        _, states = jax.lax.scan(step, jnp.zeros((Fi_, S_), jnp.float32), (a_b, bx_b))
        return states

    states = jax.vmap(scan_one)(A_bar, BX)
    y = jnp.einsum('blfs,bls->blf', states, Cm) + D * hc
    h = y * (h0 * jax.nn.sigmoid(h0))
    pmu = jnp.mean(h, axis=2, keepdims=True)
    pvar = jnp.mean((h - pmu) ** 2, axis=2, keepdims=True)
    hn = (h - pmu) / jnp.sqrt(pvar + _EPS)
    return hn @ w_out + b_out + x0


if __name__ == "__main__":
    B, L = 2, 16
    n_features, n_states, n_layers, expansion = 16, 4, 2, 2

    key = jax.random.PRNGKey(0)
    kx, *layer_keys = jax.random.split(key, n_layers + 1)
    x = jax.random.normal(kx, (B, L, n_features), jnp.float32)
    raw_params = [init_block_params(k, n_features, n_states, expansion) for k in layer_keys]
    packed = pack_params(raw_params)

    out = jax.block_until_ready(ssm_model_pallas(x, packed))

    ref = x
    for p in raw_params:
        ref = ssm_block_ref(ref, p)
    ref = jax.block_until_ready(ref)

    assert out.shape == (B, L, n_features)
    assert bool(jnp.all(jnp.isfinite(out)))
    np.testing.assert_allclose(np.asarray(out), np.asarray(ref), rtol=5e-3, atol=5e-3)
    print("KERNEL_OK")
</pallas_src>

<mosaic_0001>
module attributes {stable_mosaic.version = 11 : i64} {
  func.func @ssm_model_kernel(%arg0: i32, %arg1: memref<1x16x16xf32, #tpu.memory_space<vmem>>, %arg2: memref<2x16x32xf32, #tpu.memory_space<vmem>>, %arg3: memref<2x1x32xf32, #tpu.memory_space<vmem>>, %arg4: memref<2x96x32xf32, #tpu.memory_space<vmem>>, %arg5: memref<2x1x32xf32, #tpu.memory_space<vmem>>, %arg6: memref<2x1x128xf32, #tpu.memory_space<vmem>>, %arg7: memref<2x1x32xf32, #tpu.memory_space<vmem>>, %arg8: memref<2x32x9xf32, #tpu.memory_space<vmem>>, %arg9: memref<2x1x9xf32, #tpu.memory_space<vmem>>, %arg10: memref<2x1x32xf32, #tpu.memory_space<vmem>>, %arg11: memref<2x1x32xf32, #tpu.memory_space<vmem>>, %arg12: memref<2x32x16xf32, #tpu.memory_space<vmem>>, %arg13: memref<2x1x16xf32, #tpu.memory_space<vmem>>, %arg14: memref<1x16x16xf32, #tpu.memory_space<vmem>>) attributes {dimension_semantics = [#tpu.dimension_semantics<parallel>], iteration_bounds = array<i64: 2>, scalar_prefetch = 0 : i64, scratch_operands = 0 : i64, tpu.core_type = #tpu.core_type<tc>, window_params = [{transform_indices = @transform_0, window_bounds = array<i64: 1, 16, 16>}, {pipeline_mode = #tpu.pipeline_mode<synchronous>, transform_indices = @transform_1, window_bounds = array<i64: 2, 16, 32>}, {pipeline_mode = #tpu.pipeline_mode<synchronous>, transform_indices = @transform_2, window_bounds = array<i64: 2, 1, 32>}, {pipeline_mode = #tpu.pipeline_mode<synchronous>, transform_indices = @transform_3, window_bounds = array<i64: 2, 96, 32>}, {pipeline_mode = #tpu.pipeline_mode<synchronous>, transform_indices = @transform_4, window_bounds = array<i64: 2, 1, 32>}, {pipeline_mode = #tpu.pipeline_mode<synchronous>, transform_indices = @transform_5, window_bounds = array<i64: 2, 1, 128>}, {pipeline_mode = #tpu.pipeline_mode<synchronous>, transform_indices = @transform_6, window_bounds = array<i64: 2, 1, 32>}, {pipeline_mode = #tpu.pipeline_mode<synchronous>, transform_indices = @transform_7, window_bounds = array<i64: 2, 32, 9>}, {pipeline_mode = #tpu.pipeline_mode<synchronous>, transform_indices = @transform_8, window_bounds = array<i64: 2, 1, 9>}, {pipeline_mode = #tpu.pipeline_mode<synchronous>, transform_indices = @transform_9, window_bounds = array<i64: 2, 1, 32>}, {pipeline_mode = #tpu.pipeline_mode<synchronous>, transform_indices = @transform_10, window_bounds = array<i64: 2, 1, 32>}, {pipeline_mode = #tpu.pipeline_mode<synchronous>, transform_indices = @transform_11, window_bounds = array<i64: 2, 32, 16>}, {pipeline_mode = #tpu.pipeline_mode<synchronous>, transform_indices = @transform_12, window_bounds = array<i64: 2, 1, 16>}, {transform_indices = @transform_13, window_bounds = array<i64: 1, 16, 16>}]} {
    %c0 = arith.constant 0 : index
    %c0_0 = arith.constant 0 : index
    %c0_1 = arith.constant 0 : index
    %0 = vector.load %arg1[%c0, %c0_0, %c0_1] : memref<1x16x16xf32, #tpu.memory_space<vmem>>, vector<1x16x16xf32>
    %1 = vector.shape_cast %0 : vector<1x16x16xf32> to vector<16x16xf32>
    %2 = vector.shape_cast %1 : vector<16x16xf32> to vector<1x16x16xf32>
    %cst = arith.constant dense<0.000000e+00> : vector<1xf32>
    %3 = vector.multi_reduction <add>, %2, %cst [1, 2] : vector<1x16x16xf32> to vector<1xf32>
    %4 = vector.shape_cast %3 : vector<1xf32> to vector<1x1x1xf32>
    %5 = vector.extract %4[0, 0, 0] : f32 from vector<1x1x1xf32>
    %cst_2 = arith.constant 2.560000e+02 : f32
    %6 = arith.divf %5, %cst_2 : f32
    %7 = vector.broadcast %6 : f32 to vector<16x16xf32>
    %8 = arith.subf %1, %7 : vector<16x16xf32>
    %9 = arith.mulf %8, %8 : vector<16x16xf32>
    %10 = vector.shape_cast %9 : vector<16x16xf32> to vector<1x16x16xf32>
    %cst_3 = arith.constant dense<0.000000e+00> : vector<1xf32>
    %11 = vector.multi_reduction <add>, %10, %cst_3 [1, 2] : vector<1x16x16xf32> to vector<1xf32>
    %12 = vector.shape_cast %11 : vector<1xf32> to vector<1x1x1xf32>
    %13 = vector.extract %12[0, 0, 0] : f32 from vector<1x1x1xf32>
    %cst_4 = arith.constant 2.560000e+02 : f32
    %14 = arith.divf %13, %cst_4 : f32
    %15 = vector.broadcast %6 : f32 to vector<16x16xf32>
    %16 = arith.subf %1, %15 : vector<16x16xf32>
    %cst_5 = arith.constant 9.99999974E-6 : f32
    %17 = arith.addf %14, %cst_5 : f32
    %18 = math.rsqrt %17 : f32
    %19 = vector.broadcast %18 : f32 to vector<16x16xf32>
    %20 = arith.mulf %16, %19 : vector<16x16xf32>
    %c0_6 = arith.constant 0 : index
    %c0_7 = arith.constant 0 : index
    %c0_8 = arith.constant 0 : index
    %21 = vector.load %arg2[%c0_6, %c0_7, %c0_8] : memref<2x16x32xf32, #tpu.memory_space<vmem>>, vector<1x16x32xf32>
    %22 = vector.shape_cast %21 : vector<1x16x32xf32> to vector<16x32xf32>
    %cst_9 = arith.constant dense<0.000000e+00> : vector<16x32xf32>
    %23 = tpu.matmul %20, %22, %cst_9 {dimension_numbers = #tpu.dot_dimension_numbers<[1], [0], [0], [1], [0, 0, 1, 1], [], []>} : vector<16x16xf32>, vector<16x32xf32>, vector<16x32xf32> -> vector<16x32xf32>
    %c0_10 = arith.constant 0 : index
    %c0_11 = arith.constant 0 : index
    %c0_12 = arith.constant 0 : index
    %24 = vector.load %arg3[%c0_10, %c0_11, %c0_12] : memref<2x1x32xf32, #tpu.memory_space<vmem>>, vector<1x1x32xf32>
    %25 = vector.shape_cast %24 : vector<1x1x32xf32> to vector<1x32xf32>
    %26 = vector.broadcast %25 : vector<1x32xf32> to vector<16x32xf32>
    %27 = arith.addf %23, %26 : vector<16x32xf32>
    %cst_13 = arith.constant 0.000000e+00 : f32
    %28 = vector.broadcast %cst_13 : f32 to vector<1x32xf32>
    %29 = vector.extract_strided_slice %27 {offsets = [0, 0], sizes = [15, 32], strides = [1, 1]} : vector<16x32xf32> to vector<15x32xf32>
    %30 = tpu.concatenate %28, %29 in 0 : vector<1x32xf32>, vector<15x32xf32> -> vector<16x32xf32>
    %31 = vector.extract_strided_slice %27 {offsets = [1, 0], sizes = [15, 32], strides = [1, 1]} : vector<16x32xf32> to vector<15x32xf32>
    %32 = tpu.concatenate %31, %28 in 0 : vector<15x32xf32>, vector<1x32xf32> -> vector<16x32xf32>
    %33 = tpu.concatenate %30, %27, %32 in 1 : vector<16x32xf32>, vector<16x32xf32>, vector<16x32xf32> -> vector<16x96xf32>
    %c0_14 = arith.constant 0 : index
    %c0_15 = arith.constant 0 : index
    %c0_16 = arith.constant 0 : index
    %34 = vector.load %arg4[%c0_14, %c0_15, %c0_16] : memref<2x96x32xf32, #tpu.memory_space<vmem>>, vector<1x96x32xf32>
    %35 = vector.shape_cast %34 : vector<1x96x32xf32> to vector<96x32xf32>
    %cst_17 = arith.constant dense<0.000000e+00> : vector<16x32xf32>
    %36 = tpu.matmul %33, %35, %cst_17 {dimension_numbers = #tpu.dot_dimension_numbers<[1], [0], [0], [1], [0, 0, 1, 1], [], []>} : vector<16x96xf32>, vector<96x32xf32>, vector<16x32xf32> -> vector<16x32xf32>
    %c0_18 = arith.constant 0 : index
    %c0_19 = arith.constant 0 : index
    %c0_20 = arith.constant 0 : index
    %37 = vector.load %arg5[%c0_18, %c0_19, %c0_20] : memref<2x1x32xf32, #tpu.memory_space<vmem>>, vector<1x1x32xf32>
    %38 = vector.shape_cast %37 : vector<1x1x32xf32> to vector<1x32xf32>
    %39 = vector.broadcast %38 : vector<1x32xf32> to vector<16x32xf32>
    %40 = arith.addf %36, %39 : vector<16x32xf32>
    %cst_21 = arith.constant dense<0.000000e+00> : vector<32xf32>
    %41 = vector.multi_reduction <add>, %40, %cst_21 [0] : vector<16x32xf32> to vector<32xf32>
    %42 = vector.shape_cast %41 : vector<32xf32> to vector<1x32xf32>
    %cst_22 = arith.constant 1.600000e+01 : f32
    %43 = vector.broadcast %cst_22 : f32 to vector<1x32xf32>
    %44 = arith.divf %42, %43 : vector<1x32xf32>
    %45 = vector.broadcast %44 : vector<1x32xf32> to vector<16x32xf32>
    %46 = arith.subf %40, %45 : vector<16x32xf32>
    %47 = arith.mulf %46, %46 : vector<16x32xf32>
    %cst_23 = arith.constant dense<0.000000e+00> : vector<32xf32>
    %48 = vector.multi_reduction <add>, %47, %cst_23 [0] : vector<16x32xf32> to vector<32xf32>
    %49 = vector.shape_cast %48 : vector<32xf32> to vector<1x32xf32>
    %cst_24 = arith.constant 1.600000e+01 : f32
    %50 = vector.broadcast %cst_24 : f32 to vector<1x32xf32>
    %51 = arith.divf %49, %50 : vector<1x32xf32>
    %52 = vector.broadcast %44 : vector<1x32xf32> to vector<16x32xf32>
    %53 = arith.subf %40, %52 : vector<16x32xf32>
    %cst_25 = arith.constant 9.99999974E-6 : f32
    %54 = vector.broadcast %cst_25 : f32 to vector<1x32xf32>
    %55 = arith.addf %51, %54 : vector<1x32xf32>
    %56 = math.rsqrt %55 : vector<1x32xf32>
    %57 = vector.broadcast %56 : vector<1x32xf32> to vector<16x32xf32>
    %58 = arith.mulf %53, %57 : vector<16x32xf32>
    %59 = arith.negf %58 : vector<16x32xf32>
    %60 = math.exp %59 : vector<16x32xf32>
    %cst_26 = arith.constant 1.000000e+00 : f32
    %61 = vector.broadcast %cst_26 : f32 to vector<16x32xf32>
    %62 = arith.addf %61, %60 : vector<16x32xf32>
    %63 = arith.divf %61, %62 : vector<16x32xf32>
    %64 = arith.mulf %58, %63 : vector<16x32xf32>
    %c0_27 = arith.constant 0 : index
    %c0_28 = arith.constant 0 : index
    %c0_29 = arith.constant 0 : index
    %65 = vector.load %arg8[%c0_27, %c0_28, %c0_29] : memref<2x32x9xf32, #tpu.memory_space<vmem>>, vector<1x32x9xf32>
    %66 = vector.shape_cast %65 : vector<1x32x9xf32> to vector<32x9xf32>
    %cst_30 = arith.constant dense<0.000000e+00> : vector<16x9xf32>
    %67 = tpu.matmul %64, %66, %cst_30 {dimension_numbers = #tpu.dot_dimension_numbers<[1], [0], [0], [1], [0, 0, 1, 1], [], []>} : vector<16x32xf32>, vector<32x9xf32>, vector<16x9xf32> -> vector<16x9xf32>
    %c0_31 = arith.constant 0 : index
    %c0_32 = arith.constant 0 : index
    %c0_33 = arith.constant 0 : index
    %68 = vector.load %arg9[%c0_31, %c0_32, %c0_33] : memref<2x1x9xf32, #tpu.memory_space<vmem>>, vector<1x1x9xf32>
    %69 = vector.shape_cast %68 : vector<1x1x9xf32> to vector<1x9xf32>
    %70 = vector.broadcast %69 : vector<1x9xf32> to vector<16x9xf32>
    %71 = arith.addf %67, %70 : vector<16x9xf32>
    %72 = vector.extract_strided_slice %71 {offsets = [0, 0], sizes = [16, 4], strides = [1, 1]} : vector<16x9xf32> to vector<16x4xf32>
    %73 = vector.extract_strided_slice %71 {offsets = [0, 4], sizes = [16, 4], strides = [1, 1]} : vector<16x9xf32> to vector<16x4xf32>
    %74 = vector.extract_strided_slice %71 {offsets = [0, 8], sizes = [16, 1], strides = [1, 1]} : vector<16x9xf32> to vector<16x1xf32>
    %c0_34 = arith.constant 0 : index
    %c0_35 = arith.constant 0 : index
    %c0_36 = arith.constant 0 : index
    %75 = vector.load %arg10[%c0_34, %c0_35, %c0_36] : memref<2x1x32xf32, #tpu.memory_space<vmem>>, vector<1x1x32xf32>
    %76 = vector.shape_cast %75 : vector<1x1x32xf32> to vector<1x32xf32>
    %cst_37 = arith.constant dense<0.000000e+00> : vector<16x32xf32>
    %77 = tpu.matmul %74, %76, %cst_37 {dimension_numbers = #tpu.dot_dimension_numbers<[1], [0], [0], [1], [0, 0, 1, 1], [], []>} : vector<16x1xf32>, vector<1x32xf32>, vector<16x32xf32> -> vector<16x32xf32>
    %c0_38 = arith.constant 0 : index
    %c0_39 = arith.constant 0 : index
    %c0_40 = arith.constant 0 : index
    %78 = vector.load %arg11[%c0_38, %c0_39, %c0_40] : memref<2x1x32xf32, #tpu.memory_space<vmem>>, vector<1x1x32xf32>
    %79 = vector.shape_cast %78 : vector<1x1x32xf32> to vector<1x32xf32>
    %80 = vector.broadcast %79 : vector<1x32xf32> to vector<16x32xf32>
    %81 = arith.addf %77, %80 : vector<16x32xf32>
    %cst_41 = arith.constant 0.000000e+00 : f32
    %82 = vector.broadcast %cst_41 : f32 to vector<16x32xf32>
    %83 = arith.maximumf %81, %82 : vector<16x32xf32>
    %84 = vector.broadcast %cst_41 : f32 to vector<16x32xf32>
    %85 = arith.subf %81, %84 : vector<16x32xf32>
    %86 = arith.cmpf one, %85, %85 : vector<16x32xf32>
    %87 = vector.broadcast %cst_41 : f32 to vector<16x32xf32>
    %88 = arith.addf %81, %87 : vector<16x32xf32>
    %89 = math.absf %85 : vector<16x32xf32>
    %cst_42 = arith.constant 0.000000e+00 : f32
    %90 = vector.broadcast %cst_42 : f32 to vector<16x32xf32>
    %91 = arith.subf %90, %89 : vector<16x32xf32>
    %92 = math.exp %91 : vector<16x32xf32>
    %93 = math.log1p %92 : vector<16x32xf32>
    %94 = arith.addf %83, %93 : vector<16x32xf32>
    %95 = arith.select %86, %88, %94 : vector<16x32xi1>, vector<16x32xf32>
    %96 = tpu.concatenate %95, %95, %95, %95 in 1 : vector<16x32xf32>, vector<16x32xf32>, vector<16x32xf32>, vector<16x32xf32> -> vector<16x128xf32>
    %cst_43 = arith.constant 0.000000e+00 : f32
    %97 = vector.broadcast %cst_43 : f32 to vector<16x128xf32>
    %98 = arith.subf %97, %96 : vector<16x128xf32>
    %c0_44 = arith.constant 0 : index
    %c0_45 = arith.constant 0 : index
    %c0_46 = arith.constant 0 : index
    %99 = vector.load %arg6[%c0_44, %c0_45, %c0_46] : memref<2x1x128xf32, #tpu.memory_space<vmem>>, vector<1x1x128xf32>
    %100 = vector.shape_cast %99 : vector<1x1x128xf32> to vector<1x128xf32>
    %101 = vector.broadcast %100 : vector<1x128xf32> to vector<16x128xf32>
    %102 = arith.mulf %98, %101 : vector<16x128xf32>
    %103 = math.exp %102 : vector<16x128xf32>
    %104 = arith.mulf %95, %64 : vector<16x32xf32>
    %105 = vector.extract_strided_slice %72 {offsets = [0, 0], sizes = [16, 1], strides = [1, 1]} : vector<16x4xf32> to vector<16x1xf32>
    %106 = vector.broadcast %105 : vector<16x1xf32> to vector<16x32xf32>
    %107 = arith.mulf %104, %106 : vector<16x32xf32>
    %108 = vector.extract_strided_slice %72 {offsets = [0, 1], sizes = [16, 1], strides = [1, 1]} : vector<16x4xf32> to vector<16x1xf32>
    %109 = vector.broadcast %108 : vector<16x1xf32> to vector<16x32xf32>
    %110 = arith.mulf %104, %109 : vector<16x32xf32>
    %111 = vector.extract_strided_slice %72 {offsets = [0, 2], sizes = [16, 1], strides = [1, 1]} : vector<16x4xf32> to vector<16x1xf32>
    %112 = vector.broadcast %111 : vector<16x1xf32> to vector<16x32xf32>
    %113 = arith.mulf %104, %112 : vector<16x32xf32>
    %114 = vector.extract_strided_slice %72 {offsets = [0, 3], sizes = [16, 1], strides = [1, 1]} : vector<16x4xf32> to vector<16x1xf32>
    %115 = vector.broadcast %114 : vector<16x1xf32> to vector<16x32xf32>
    %116 = arith.mulf %104, %115 : vector<16x32xf32>
    %117 = tpu.concatenate %107, %110, %113, %116 in 1 : vector<16x32xf32>, vector<16x32xf32>, vector<16x32xf32>, vector<16x32xf32> -> vector<16x128xf32>
    %cst_47 = arith.constant 1.000000e+00 : f32
    %118 = vector.broadcast %cst_47 : f32 to vector<1x128xf32>
    %119 = vector.extract_strided_slice %103 {offsets = [0, 0], sizes = [15, 128], strides = [1, 1]} : vector<16x128xf32> to vector<15x128xf32>
    %120 = tpu.concatenate %118, %119 in 0 : vector<1x128xf32>, vector<15x128xf32> -> vector<16x128xf32>
    %cst_48 = arith.constant 0.000000e+00 : f32
    %121 = vector.broadcast %cst_48 : f32 to vector<1x128xf32>
    %122 = vector.extract_strided_slice %117 {offsets = [0, 0], sizes = [15, 128], strides = [1, 1]} : vector<16x128xf32> to vector<15x128xf32>
    %123 = tpu.concatenate %121, %122 in 0 : vector<1x128xf32>, vector<15x128xf32> -> vector<16x128xf32>
    %124 = arith.mulf %103, %123 : vector<16x128xf32>
    %125 = arith.addf %124, %117 : vector<16x128xf32>
    %126 = arith.mulf %103, %120 : vector<16x128xf32>
    %cst_49 = arith.constant 1.000000e+00 : f32
    %127 = vector.broadcast %cst_49 : f32 to vector<2x128xf32>
    %128 = vector.extract_strided_slice %126 {offsets = [0, 0], sizes = [14, 128], strides = [1, 1]} : vector<16x128xf32> to vector<14x128xf32>
    %129 = tpu.concatenate %127, %128 in 0 : vector<2x128xf32>, vector<14x128xf32> -> vector<16x128xf32>
    %cst_50 = arith.constant 0.000000e+00 : f32
    %130 = vector.broadcast %cst_50 : f32 to vector<2x128xf32>
    %131 = vector.extract_strided_slice %125 {offsets = [0, 0], sizes = [14, 128], strides = [1, 1]} : vector<16x128xf32> to vector<14x128xf32>
    %132 = tpu.concatenate %130, %131 in 0 : vector<2x128xf32>, vector<14x128xf32> -> vector<16x128xf32>
    %133 = arith.mulf %126, %132 : vector<16x128xf32>
    %134 = arith.addf %133, %125 : vector<16x128xf32>
    %135 = arith.mulf %126, %129 : vector<16x128xf32>
    %cst_51 = arith.constant 1.000000e+00 : f32
    %136 = vector.broadcast %cst_51 : f32 to vector<4x128xf32>
    %137 = vector.extract_strided_slice %135 {offsets = [0, 0], sizes = [12, 128], strides = [1, 1]} : vector<16x128xf32> to vector<12x128xf32>
    %138 = tpu.concatenate %136, %137 in 0 : vector<4x128xf32>, vector<12x128xf32> -> vector<16x128xf32>
    %cst_52 = arith.constant 0.000000e+00 : f32
    %139 = vector.broadcast %cst_52 : f32 to vector<4x128xf32>
    %140 = vector.extract_strided_slice %134 {offsets = [0, 0], sizes = [12, 128], strides = [1, 1]} : vector<16x128xf32> to vector<12x128xf32>
    %141 = tpu.concatenate %139, %140 in 0 : vector<4x128xf32>, vector<12x128xf32> -> vector<16x128xf32>
    %142 = arith.mulf %135, %141 : vector<16x128xf32>
    %143 = arith.addf %142, %134 : vector<16x128xf32>
    %144 = arith.mulf %135, %138 : vector<16x128xf32>
    %cst_53 = arith.constant 0.000000e+00 : f32
    %145 = vector.broadcast %cst_53 : f32 to vector<8x128xf32>
    %146 = vector.extract_strided_slice %143 {offsets = [0, 0], sizes = [8, 128], strides = [1, 1]} : vector<16x128xf32> to vector<8x128xf32>
    %147 = tpu.concatenate %145, %146 in 0 : vector<8x128xf32>, vector<8x128xf32> -> vector<16x128xf32>
    %148 = arith.mulf %144, %147 : vector<16x128xf32>
    %149 = arith.addf %148, %143 : vector<16x128xf32>
    %150 = vector.extract_strided_slice %149 {offsets = [0, 0], sizes = [16, 32], strides = [1, 1]} : vector<16x128xf32> to vector<16x32xf32>
    %151 = vector.extract_strided_slice %73 {offsets = [0, 0], sizes = [16, 1], strides = [1, 1]} : vector<16x4xf32> to vector<16x1xf32>
    %152 = vector.broadcast %151 : vector<16x1xf32> to vector<16x32xf32>
    %153 = arith.mulf %150, %152 : vector<16x32xf32>
    %154 = vector.extract_strided_slice %149 {offsets = [0, 32], sizes = [16, 32], strides = [1, 1]} : vector<16x128xf32> to vector<16x32xf32>
    %155 = vector.extract_strided_slice %73 {offsets = [0, 1], sizes = [16, 1], strides = [1, 1]} : vector<16x4xf32> to vector<16x1xf32>
    %156 = vector.broadcast %155 : vector<16x1xf32> to vector<16x32xf32>
    %157 = arith.mulf %154, %156 : vector<16x32xf32>
    %158 = arith.addf %153, %157 : vector<16x32xf32>
    %159 = vector.extract_strided_slice %149 {offsets = [0, 64], sizes = [16, 32], strides = [1, 1]} : vector<16x128xf32> to vector<16x32xf32>
    %160 = vector.extract_strided_slice %73 {offsets = [0, 2], sizes = [16, 1], strides = [1, 1]} : vector<16x4xf32> to vector<16x1xf32>
    %161 = vector.broadcast %160 : vector<16x1xf32> to vector<16x32xf32>
    %162 = arith.mulf %159, %161 : vector<16x32xf32>
    %163 = arith.addf %158, %162 : vector<16x32xf32>
    %164 = vector.extract_strided_slice %149 {offsets = [0, 96], sizes = [16, 32], strides = [1, 1]} : vector<16x128xf32> to vector<16x32xf32>
    %165 = vector.extract_strided_slice %73 {offsets = [0, 3], sizes = [16, 1], strides = [1, 1]} : vector<16x4xf32> to vector<16x1xf32>
    %166 = vector.broadcast %165 : vector<16x1xf32> to vector<16x32xf32>
    %167 = arith.mulf %164, %166 : vector<16x32xf32>
    %168 = arith.addf %163, %167 : vector<16x32xf32>
    %c0_54 = arith.constant 0 : index
    %c0_55 = arith.constant 0 : index
    %c0_56 = arith.constant 0 : index
    %169 = vector.load %arg7[%c0_54, %c0_55, %c0_56] : memref<2x1x32xf32, #tpu.memory_space<vmem>>, vector<1x1x32xf32>
    %170 = vector.shape_cast %169 : vector<1x1x32xf32> to vector<1x32xf32>
    %171 = vector.broadcast %170 : vector<1x32xf32> to vector<16x32xf32>
    %172 = arith.mulf %171, %64 : vector<16x32xf32>
    %173 = arith.addf %168, %172 : vector<16x32xf32>
    %174 = arith.negf %27 : vector<16x32xf32>
    %175 = math.exp %174 : vector<16x32xf32>
    %cst_57 = arith.constant 1.000000e+00 : f32
    %176 = vector.broadcast %cst_57 : f32 to vector<16x32xf32>
    %177 = arith.addf %176, %175 : vector<16x32xf32>
    %178 = arith.divf %176, %177 : vector<16x32xf32>
    %179 = arith.mulf %27, %178 : vector<16x32xf32>
    %180 = arith.mulf %173, %179 : vector<16x32xf32>
    %cst_58 = arith.constant dense<0.000000e+00> : vector<16xf32>
    %181 = vector.multi_reduction <add>, %180, %cst_58 [1] : vector<16x32xf32> to vector<16xf32>
    %182 = vector.shape_cast %181 : vector<16xf32> to vector<16x1xf32>
    %cst_59 = arith.constant 3.200000e+01 : f32
    %183 = vector.broadcast %cst_59 : f32 to vector<16x1xf32>
    %184 = arith.divf %182, %183 : vector<16x1xf32>
    %185 = vector.broadcast %184 : vector<16x1xf32> to vector<16x32xf32>
    %186 = arith.subf %180, %185 : vector<16x32xf32>
    %187 = arith.mulf %186, %186 : vector<16x32xf32>
    %cst_60 = arith.constant dense<0.000000e+00> : vector<16xf32>
    %188 = vector.multi_reduction <add>, %187, %cst_60 [1] : vector<16x32xf32> to vector<16xf32>
    %189 = vector.shape_cast %188 : vector<16xf32> to vector<16x1xf32>
    %cst_61 = arith.constant 3.200000e+01 : f32
    %190 = vector.broadcast %cst_61 : f32 to vector<16x1xf32>
    %191 = arith.divf %189, %190 : vector<16x1xf32>
    %192 = vector.broadcast %184 : vector<16x1xf32> to vector<16x32xf32>
    %193 = arith.subf %180, %192 : vector<16x32xf32>
    %cst_62 = arith.constant 9.99999974E-6 : f32
    %194 = vector.broadcast %cst_62 : f32 to vector<16x1xf32>
    %195 = arith.addf %191, %194 : vector<16x1xf32>
    %196 = math.rsqrt %195 : vector<16x1xf32>
    %197 = vector.broadcast %196 : vector<16x1xf32> to vector<16x32xf32>
    %198 = arith.mulf %193, %197 : vector<16x32xf32>
    %c0_63 = arith.constant 0 : index
    %c0_64 = arith.constant 0 : index
    %c0_65 = arith.constant 0 : index
    %199 = vector.load %arg12[%c0_63, %c0_64, %c0_65] : memref<2x32x16xf32, #tpu.memory_space<vmem>>, vector<1x32x16xf32>
    %200 = vector.shape_cast %199 : vector<1x32x16xf32> to vector<32x16xf32>
    %cst_66 = arith.constant dense<0.000000e+00> : vector<16x16xf32>
    %201 = tpu.matmul %198, %200, %cst_66 {dimension_numbers = #tpu.dot_dimension_numbers<[1], [0], [0], [1], [0, 0, 1, 1], [], []>} : vector<16x32xf32>, vector<32x16xf32>, vector<16x16xf32> -> vector<16x16xf32>
    %c0_67 = arith.constant 0 : index
    %c0_68 = arith.constant 0 : index
    %c0_69 = arith.constant 0 : index
    %202 = vector.load %arg13[%c0_67, %c0_68, %c0_69] : memref<2x1x16xf32, #tpu.memory_space<vmem>>, vector<1x1x16xf32>
    %203 = vector.shape_cast %202 : vector<1x1x16xf32> to vector<1x16xf32>
    %204 = vector.broadcast %203 : vector<1x16xf32> to vector<16x16xf32>
    %205 = arith.addf %201, %204 : vector<16x16xf32>
    %206 = arith.addf %205, %1 : vector<16x16xf32>
    %207 = vector.shape_cast %206 : vector<16x16xf32> to vector<1x16x16xf32>
    %cst_70 = arith.constant dense<0.000000e+00> : vector<1xf32>
    %208 = vector.multi_reduction <add>, %207, %cst_70 [1, 2] : vector<1x16x16xf32> to vector<1xf32>
    %209 = vector.shape_cast %208 : vector<1xf32> to vector<1x1x1xf32>
    %210 = vector.extract %209[0, 0, 0] : f32 from vector<1x1x1xf32>
    %cst_71 = arith.constant 2.560000e+02 : f32
    %211 = arith.divf %210, %cst_71 : f32
    %212 = vector.broadcast %211 : f32 to vector<16x16xf32>
    %213 = arith.subf %206, %212 : vector<16x16xf32>
    %214 = arith.mulf %213, %213 : vector<16x16xf32>
    %215 = vector.shape_cast %214 : vector<16x16xf32> to vector<1x16x16xf32>
    %cst_72 = arith.constant dense<0.000000e+00> : vector<1xf32>
    %216 = vector.multi_reduction <add>, %215, %cst_72 [1, 2] : vector<1x16x16xf32> to vector<1xf32>
    %217 = vector.shape_cast %216 : vector<1xf32> to vector<1x1x1xf32>
    %218 = vector.extract %217[0, 0, 0] : f32 from vector<1x1x1xf32>
    %cst_73 = arith.constant 2.560000e+02 : f32
    %219 = arith.divf %218, %cst_73 : f32
    %220 = vector.broadcast %211 : f32 to vector<16x16xf32>
    %221 = arith.subf %206, %220 : vector<16x16xf32>
    %cst_74 = arith.constant 9.99999974E-6 : f32
    %222 = arith.addf %219, %cst_74 : f32
    %223 = math.rsqrt %222 : f32
    %224 = vector.broadcast %223 : f32 to vector<16x16xf32>
    %225 = arith.mulf %221, %224 : vector<16x16xf32>
    %c1 = arith.constant 1 : index
    %c0_75 = arith.constant 0 : index
    %c0_76 = arith.constant 0 : index
    %226 = vector.load %arg2[%c1, %c0_75, %c0_76] : memref<2x16x32xf32, #tpu.memory_space<vmem>>, vector<1x16x32xf32>
    %227 = vector.shape_cast %226 : vector<1x16x32xf32> to vector<16x32xf32>
    %cst_77 = arith.constant dense<0.000000e+00> : vector<16x32xf32>
    %228 = tpu.matmul %225, %227, %cst_77 {dimension_numbers = #tpu.dot_dimension_numbers<[1], [0], [0], [1], [0, 0, 1, 1], [], []>} : vector<16x16xf32>, vector<16x32xf32>, vector<16x32xf32> -> vector<16x32xf32>
    %c1_78 = arith.constant 1 : index
    %c0_79 = arith.constant 0 : index
    %c0_80 = arith.constant 0 : index
    %229 = vector.load %arg3[%c1_78, %c0_79, %c0_80] : memref<2x1x32xf32, #tpu.memory_space<vmem>>, vector<1x1x32xf32>
    %230 = vector.shape_cast %229 : vector<1x1x32xf32> to vector<1x32xf32>
    %231 = vector.broadcast %230 : vector<1x32xf32> to vector<16x32xf32>
    %232 = arith.addf %228, %231 : vector<16x32xf32>
    %cst_81 = arith.constant 0.000000e+00 : f32
    %233 = vector.broadcast %cst_81 : f32 to vector<1x32xf32>
    %234 = vector.extract_strided_slice %232 {offsets = [0, 0], sizes = [15, 32], strides = [1, 1]} : vector<16x32xf32> to vector<15x32xf32>
    %235 = tpu.concatenate %233, %234 in 0 : vector<1x32xf32>, vector<15x32xf32> -> vector<16x32xf32>
    %236 = vector.extract_strided_slice %232 {offsets = [1, 0], sizes = [15, 32], strides = [1, 1]} : vector<16x32xf32> to vector<15x32xf32>
    %237 = tpu.concatenate %236, %233 in 0 : vector<15x32xf32>, vector<1x32xf32> -> vector<16x32xf32>
    %238 = tpu.concatenate %235, %232, %237 in 1 : vector<16x32xf32>, vector<16x32xf32>, vector<16x32xf32> -> vector<16x96xf32>
    %c1_82 = arith.constant 1 : index
    %c0_83 = arith.constant 0 : index
    %c0_84 = arith.constant 0 : index
    %239 = vector.load %arg4[%c1_82, %c0_83, %c0_84] : memref<2x96x32xf32, #tpu.memory_space<vmem>>, vector<1x96x32xf32>
    %240 = vector.shape_cast %239 : vector<1x96x32xf32> to vector<96x32xf32>
    %cst_85 = arith.constant dense<0.000000e+00> : vector<16x32xf32>
    %241 = tpu.matmul %238, %240, %cst_85 {dimension_numbers = #tpu.dot_dimension_numbers<[1], [0], [0], [1], [0, 0, 1, 1], [], []>} : vector<16x96xf32>, vector<96x32xf32>, vector<16x32xf32> -> vector<16x32xf32>
    %c1_86 = arith.constant 1 : index
    %c0_87 = arith.constant 0 : index
    %c0_88 = arith.constant 0 : index
    %242 = vector.load %arg5[%c1_86, %c0_87, %c0_88] : memref<2x1x32xf32, #tpu.memory_space<vmem>>, vector<1x1x32xf32>
    %243 = vector.shape_cast %242 : vector<1x1x32xf32> to vector<1x32xf32>
    %244 = vector.broadcast %243 : vector<1x32xf32> to vector<16x32xf32>
    %245 = arith.addf %241, %244 : vector<16x32xf32>
    %cst_89 = arith.constant dense<0.000000e+00> : vector<32xf32>
    %246 = vector.multi_reduction <add>, %245, %cst_89 [0] : vector<16x32xf32> to vector<32xf32>
    %247 = vector.shape_cast %246 : vector<32xf32> to vector<1x32xf32>
    %cst_90 = arith.constant 1.600000e+01 : f32
    %248 = vector.broadcast %cst_90 : f32 to vector<1x32xf32>
    %249 = arith.divf %247, %248 : vector<1x32xf32>
    %250 = vector.broadcast %249 : vector<1x32xf32> to vector<16x32xf32>
    %251 = arith.subf %245, %250 : vector<16x32xf32>
    %252 = arith.mulf %251, %251 : vector<16x32xf32>
    %cst_91 = arith.constant dense<0.000000e+00> : vector<32xf32>
    %253 = vector.multi_reduction <add>, %252, %cst_91 [0] : vector<16x32xf32> to vector<32xf32>
    %254 = vector.shape_cast %253 : vector<32xf32> to vector<1x32xf32>
    %cst_92 = arith.constant 1.600000e+01 : f32
    %255 = vector.broadcast %cst_92 : f32 to vector<1x32xf32>
    %256 = arith.divf %254, %255 : vector<1x32xf32>
    %257 = vector.broadcast %249 : vector<1x32xf32> to vector<16x32xf32>
    %258 = arith.subf %245, %257 : vector<16x32xf32>
    %cst_93 = arith.constant 9.99999974E-6 : f32
    %259 = vector.broadcast %cst_93 : f32 to vector<1x32xf32>
    %260 = arith.addf %256, %259 : vector<1x32xf32>
    %261 = math.rsqrt %260 : vector<1x32xf32>
    %262 = vector.broadcast %261 : vector<1x32xf32> to vector<16x32xf32>
    %263 = arith.mulf %258, %262 : vector<16x32xf32>
    %264 = arith.negf %263 : vector<16x32xf32>
    %265 = math.exp %264 : vector<16x32xf32>
    %cst_94 = arith.constant 1.000000e+00 : f32
    %266 = vector.broadcast %cst_94 : f32 to vector<16x32xf32>
    %267 = arith.addf %266, %265 : vector<16x32xf32>
    %268 = arith.divf %266, %267 : vector<16x32xf32>
    %269 = arith.mulf %263, %268 : vector<16x32xf32>
    %c1_95 = arith.constant 1 : index
    %c0_96 = arith.constant 0 : index
    %c0_97 = arith.constant 0 : index
    %270 = vector.load %arg8[%c1_95, %c0_96, %c0_97] : memref<2x32x9xf32, #tpu.memory_space<vmem>>, vector<1x32x9xf32>
    %271 = vector.shape_cast %270 : vector<1x32x9xf32> to vector<32x9xf32>
    %cst_98 = arith.constant dense<0.000000e+00> : vector<16x9xf32>
    %272 = tpu.matmul %269, %271, %cst_98 {dimension_numbers = #tpu.dot_dimension_numbers<[1], [0], [0], [1], [0, 0, 1, 1], [], []>} : vector<16x32xf32>, vector<32x9xf32>, vector<16x9xf32> -> vector<16x9xf32>
    %c1_99 = arith.constant 1 : index
    %c0_100 = arith.constant 0 : index
    %c0_101 = arith.constant 0 : index
    %273 = vector.load %arg9[%c1_99, %c0_100, %c0_101] : memref<2x1x9xf32, #tpu.memory_space<vmem>>, vector<1x1x9xf32>
    %274 = vector.shape_cast %273 : vector<1x1x9xf32> to vector<1x9xf32>
    %275 = vector.broadcast %274 : vector<1x9xf32> to vector<16x9xf32>
    %276 = arith.addf %272, %275 : vector<16x9xf32>
    %277 = vector.extract_strided_slice %276 {offsets = [0, 0], sizes = [16, 4], strides = [1, 1]} : vector<16x9xf32> to vector<16x4xf32>
    %278 = vector.extract_strided_slice %276 {offsets = [0, 4], sizes = [16, 4], strides = [1, 1]} : vector<16x9xf32> to vector<16x4xf32>
    %279 = vector.extract_strided_slice %276 {offsets = [0, 8], sizes = [16, 1], strides = [1, 1]} : vector<16x9xf32> to vector<16x1xf32>
    %c1_102 = arith.constant 1 : index
    %c0_103 = arith.constant 0 : index
    %c0_104 = arith.constant 0 : index
    %280 = vector.load %arg10[%c1_102, %c0_103, %c0_104] : memref<2x1x32xf32, #tpu.memory_space<vmem>>, vector<1x1x32xf32>
    %281 = vector.shape_cast %280 : vector<1x1x32xf32> to vector<1x32xf32>
    %cst_105 = arith.constant dense<0.000000e+00> : vector<16x32xf32>
    %282 = tpu.matmul %279, %281, %cst_105 {dimension_numbers = #tpu.dot_dimension_numbers<[1], [0], [0], [1], [0, 0, 1, 1], [], []>} : vector<16x1xf32>, vector<1x32xf32>, vector<16x32xf32> -> vector<16x32xf32>
    %c1_106 = arith.constant 1 : index
    %c0_107 = arith.constant 0 : index
    %c0_108 = arith.constant 0 : index
    %283 = vector.load %arg11[%c1_106, %c0_107, %c0_108] : memref<2x1x32xf32, #tpu.memory_space<vmem>>, vector<1x1x32xf32>
    %284 = vector.shape_cast %283 : vector<1x1x32xf32> to vector<1x32xf32>
    %285 = vector.broadcast %284 : vector<1x32xf32> to vector<16x32xf32>
    %286 = arith.addf %282, %285 : vector<16x32xf32>
    %cst_109 = arith.constant 0.000000e+00 : f32
    %287 = vector.broadcast %cst_109 : f32 to vector<16x32xf32>
    %288 = arith.maximumf %286, %287 : vector<16x32xf32>
    %289 = vector.broadcast %cst_109 : f32 to vector<16x32xf32>
    %290 = arith.subf %286, %289 : vector<16x32xf32>
    %291 = arith.cmpf one, %290, %290 : vector<16x32xf32>
    %292 = vector.broadcast %cst_109 : f32 to vector<16x32xf32>
    %293 = arith.addf %286, %292 : vector<16x32xf32>
    %294 = math.absf %290 : vector<16x32xf32>
    %cst_110 = arith.constant 0.000000e+00 : f32
    %295 = vector.broadcast %cst_110 : f32 to vector<16x32xf32>
    %296 = arith.subf %295, %294 : vector<16x32xf32>
    %297 = math.exp %296 : vector<16x32xf32>
    %298 = math.log1p %297 : vector<16x32xf32>
    %299 = arith.addf %288, %298 : vector<16x32xf32>
    %300 = arith.select %291, %293, %299 : vector<16x32xi1>, vector<16x32xf32>
    %301 = tpu.concatenate %300, %300, %300, %300 in 1 : vector<16x32xf32>, vector<16x32xf32>, vector<16x32xf32>, vector<16x32xf32> -> vector<16x128xf32>
    %cst_111 = arith.constant 0.000000e+00 : f32
    %302 = vector.broadcast %cst_111 : f32 to vector<16x128xf32>
    %303 = arith.subf %302, %301 : vector<16x128xf32>
    %c1_112 = arith.constant 1 : index
    %c0_113 = arith.constant 0 : index
    %c0_114 = arith.constant 0 : index
    %304 = vector.load %arg6[%c1_112, %c0_113, %c0_114] : memref<2x1x128xf32, #tpu.memory_space<vmem>>, vector<1x1x128xf32>
    %305 = vector.shape_cast %304 : vector<1x1x128xf32> to vector<1x128xf32>
    %306 = vector.broadcast %305 : vector<1x128xf32> to vector<16x128xf32>
    %307 = arith.mulf %303, %306 : vector<16x128xf32>
    %308 = math.exp %307 : vector<16x128xf32>
    %309 = arith.mulf %300, %269 : vector<16x32xf32>
    %310 = vector.extract_strided_slice %277 {offsets = [0, 0], sizes = [16, 1], strides = [1, 1]} : vector<16x4xf32> to vector<16x1xf32>
    %311 = vector.broadcast %310 : vector<16x1xf32> to vector<16x32xf32>
    %312 = arith.mulf %309, %311 : vector<16x32xf32>
    %313 = vector.extract_strided_slice %277 {offsets = [0, 1], sizes = [16, 1], strides = [1, 1]} : vector<16x4xf32> to vector<16x1xf32>
    %314 = vector.broadcast %313 : vector<16x1xf32> to vector<16x32xf32>
    %315 = arith.mulf %309, %314 : vector<16x32xf32>
    %316 = vector.extract_strided_slice %277 {offsets = [0, 2], sizes = [16, 1], strides = [1, 1]} : vector<16x4xf32> to vector<16x1xf32>
    %317 = vector.broadcast %316 : vector<16x1xf32> to vector<16x32xf32>
    %318 = arith.mulf %309, %317 : vector<16x32xf32>
    %319 = vector.extract_strided_slice %277 {offsets = [0, 3], sizes = [16, 1], strides = [1, 1]} : vector<16x4xf32> to vector<16x1xf32>
    %320 = vector.broadcast %319 : vector<16x1xf32> to vector<16x32xf32>
    %321 = arith.mulf %309, %320 : vector<16x32xf32>
    %322 = tpu.concatenate %312, %315, %318, %321 in 1 : vector<16x32xf32>, vector<16x32xf32>, vector<16x32xf32>, vector<16x32xf32> -> vector<16x128xf32>
    %cst_115 = arith.constant 1.000000e+00 : f32
    %323 = vector.broadcast %cst_115 : f32 to vector<1x128xf32>
    %324 = vector.extract_strided_slice %308 {offsets = [0, 0], sizes = [15, 128], strides = [1, 1]} : vector<16x128xf32> to vector<15x128xf32>
    %325 = tpu.concatenate %323, %324 in 0 : vector<1x128xf32>, vector<15x128xf32> -> vector<16x128xf32>
    %cst_116 = arith.constant 0.000000e+00 : f32
    %326 = vector.broadcast %cst_116 : f32 to vector<1x128xf32>
    %327 = vector.extract_strided_slice %322 {offsets = [0, 0], sizes = [15, 128], strides = [1, 1]} : vector<16x128xf32> to vector<15x128xf32>
    %328 = tpu.concatenate %326, %327 in 0 : vector<1x128xf32>, vector<15x128xf32> -> vector<16x128xf32>
    %329 = arith.mulf %308, %328 : vector<16x128xf32>
    %330 = arith.addf %329, %322 : vector<16x128xf32>
    %331 = arith.mulf %308, %325 : vector<16x128xf32>
    %cst_117 = arith.constant 1.000000e+00 : f32
    %332 = vector.broadcast %cst_117 : f32 to vector<2x128xf32>
    %333 = vector.extract_strided_slice %331 {offsets = [0, 0], sizes = [14, 128], strides = [1, 1]} : vector<16x128xf32> to vector<14x128xf32>
    %334 = tpu.concatenate %332, %333 in 0 : vector<2x128xf32>, vector<14x128xf32> -> vector<16x128xf32>
    %cst_118 = arith.constant 0.000000e+00 : f32
    %335 = vector.broadcast %cst_118 : f32 to vector<2x128xf32>
    %336 = vector.extract_strided_slice %330 {offsets = [0, 0], sizes = [14, 128], strides = [1, 1]} : vector<16x128xf32> to vector<14x128xf32>
    %337 = tpu.concatenate %335, %336 in 0 : vector<2x128xf32>, vector<14x128xf32> -> vector<16x128xf32>
    %338 = arith.mulf %331, %337 : vector<16x128xf32>
    %339 = arith.addf %338, %330 : vector<16x128xf32>
    %340 = arith.mulf %331, %334 : vector<16x128xf32>
    %cst_119 = arith.constant 1.000000e+00 : f32
    %341 = vector.broadcast %cst_119 : f32 to vector<4x128xf32>
    %342 = vector.extract_strided_slice %340 {offsets = [0, 0], sizes = [12, 128], strides = [1, 1]} : vector<16x128xf32> to vector<12x128xf32>
    %343 = tpu.concatenate %341, %342 in 0 : vector<4x128xf32>, vector<12x128xf32> -> vector<16x128xf32>
    %cst_120 = arith.constant 0.000000e+00 : f32
    %344 = vector.broadcast %cst_120 : f32 to vector<4x128xf32>
    %345 = vector.extract_strided_slice %339 {offsets = [0, 0], sizes = [12, 128], strides = [1, 1]} : vector<16x128xf32> to vector<12x128xf32>
    %346 = tpu.concatenate %344, %345 in 0 : vector<4x128xf32>, vector<12x128xf32> -> vector<16x128xf32>
    %347 = arith.mulf %340, %346 : vector<16x128xf32>
    %348 = arith.addf %347, %339 : vector<16x128xf32>
    %349 = arith.mulf %340, %343 : vector<16x128xf32>
    %cst_121 = arith.constant 0.000000e+00 : f32
    %350 = vector.broadcast %cst_121 : f32 to vector<8x128xf32>
    %351 = vector.extract_strided_slice %348 {offsets = [0, 0], sizes = [8, 128], strides = [1, 1]} : vector<16x128xf32> to vector<8x128xf32>
    %352 = tpu.concatenate %350, %351 in 0 : vector<8x128xf32>, vector<8x128xf32> -> vector<16x128xf32>
    %353 = arith.mulf %349, %352 : vector<16x128xf32>
    %354 = arith.addf %353, %348 : vector<16x128xf32>
    %355 = vector.extract_strided_slice %354 {offsets = [0, 0], sizes = [16, 32], strides = [1, 1]} : vector<16x128xf32> to vector<16x32xf32>
    %356 = vector.extract_strided_slice %278 {offsets = [0, 0], sizes = [16, 1], strides = [1, 1]} : vector<16x4xf32> to vector<16x1xf32>
    %357 = vector.broadcast %356 : vector<16x1xf32> to vector<16x32xf32>
    %358 = arith.mulf %355, %357 : vector<16x32xf32>
    %359 = vector.extract_strided_slice %354 {offsets = [0, 32], sizes = [16, 32], strides = [1, 1]} : vector<16x128xf32> to vector<16x32xf32>
    %360 = vector.extract_strided_slice %278 {offsets = [0, 1], sizes = [16, 1], strides = [1, 1]} : vector<16x4xf32> to vector<16x1xf32>
    %361 = vector.broadcast %360 : vector<16x1xf32> to vector<16x32xf32>
    %362 = arith.mulf %359, %361 : vector<16x32xf32>
    %363 = arith.addf %358, %362 : vector<16x32xf32>
    %364 = vector.extract_strided_slice %354 {offsets = [0, 64], sizes = [16, 32], strides = [1, 1]} : vector<16x128xf32> to vector<16x32xf32>
    %365 = vector.extract_strided_slice %278 {offsets = [0, 2], sizes = [16, 1], strides = [1, 1]} : vector<16x4xf32> to vector<16x1xf32>
    %366 = vector.broadcast %365 : vector<16x1xf32> to vector<16x32xf32>
    %367 = arith.mulf %364, %366 : vector<16x32xf32>
    %368 = arith.addf %363, %367 : vector<16x32xf32>
    %369 = vector.extract_strided_slice %354 {offsets = [0, 96], sizes = [16, 32], strides = [1, 1]} : vector<16x128xf32> to vector<16x32xf32>
    %370 = vector.extract_strided_slice %278 {offsets = [0, 3], sizes = [16, 1], strides = [1, 1]} : vector<16x4xf32> to vector<16x1xf32>
    %371 = vector.broadcast %370 : vector<16x1xf32> to vector<16x32xf32>
    %372 = arith.mulf %369, %371 : vector<16x32xf32>
    %373 = arith.addf %368, %372 : vector<16x32xf32>
    %c1_122 = arith.constant 1 : index
    %c0_123 = arith.constant 0 : index
    %c0_124 = arith.constant 0 : index
    %374 = vector.load %arg7[%c1_122, %c0_123, %c0_124] : memref<2x1x32xf32, #tpu.memory_space<vmem>>, vector<1x1x32xf32>
    %375 = vector.shape_cast %374 : vector<1x1x32xf32> to vector<1x32xf32>
    %376 = vector.broadcast %375 : vector<1x32xf32> to vector<16x32xf32>
    %377 = arith.mulf %376, %269 : vector<16x32xf32>
    %378 = arith.addf %373, %377 : vector<16x32xf32>
    %379 = arith.negf %232 : vector<16x32xf32>
    %380 = math.exp %379 : vector<16x32xf32>
    %cst_125 = arith.constant 1.000000e+00 : f32
    %381 = vector.broadcast %cst_125 : f32 to vector<16x32xf32>
    %382 = arith.addf %381, %380 : vector<16x32xf32>
    %383 = arith.divf %381, %382 : vector<16x32xf32>
    %384 = arith.mulf %232, %383 : vector<16x32xf32>
    %385 = arith.mulf %378, %384 : vector<16x32xf32>
    %cst_126 = arith.constant dense<0.000000e+00> : vector<16xf32>
    %386 = vector.multi_reduction <add>, %385, %cst_126 [1] : vector<16x32xf32> to vector<16xf32>
    %387 = vector.shape_cast %386 : vector<16xf32> to vector<16x1xf32>
    %cst_127 = arith.constant 3.200000e+01 : f32
    %388 = vector.broadcast %cst_127 : f32 to vector<16x1xf32>
    %389 = arith.divf %387, %388 : vector<16x1xf32>
    %390 = vector.broadcast %389 : vector<16x1xf32> to vector<16x32xf32>
    %391 = arith.subf %385, %390 : vector<16x32xf32>
    %392 = arith.mulf %391, %391 : vector<16x32xf32>
    %cst_128 = arith.constant dense<0.000000e+00> : vector<16xf32>
    %393 = vector.multi_reduction <add>, %392, %cst_128 [1] : vector<16x32xf32> to vector<16xf32>
    %394 = vector.shape_cast %393 : vector<16xf32> to vector<16x1xf32>
    %cst_129 = arith.constant 3.200000e+01 : f32
    %395 = vector.broadcast %cst_129 : f32 to vector<16x1xf32>
    %396 = arith.divf %394, %395 : vector<16x1xf32>
    %397 = vector.broadcast %389 : vector<16x1xf32> to vector<16x32xf32>
    %398 = arith.subf %385, %397 : vector<16x32xf32>
    %cst_130 = arith.constant 9.99999974E-6 : f32
    %399 = vector.broadcast %cst_130 : f32 to vector<16x1xf32>
    %400 = arith.addf %396, %399 : vector<16x1xf32>
    %401 = math.rsqrt %400 : vector<16x1xf32>
    %402 = vector.broadcast %401 : vector<16x1xf32> to vector<16x32xf32>
    %403 = arith.mulf %398, %402 : vector<16x32xf32>
    %c1_131 = arith.constant 1 : index
    %c0_132 = arith.constant 0 : index
    %c0_133 = arith.constant 0 : index
    %404 = vector.load %arg12[%c1_131, %c0_132, %c0_133] : memref<2x32x16xf32, #tpu.memory_space<vmem>>, vector<1x32x16xf32>
    %405 = vector.shape_cast %404 : vector<1x32x16xf32> to vector<32x16xf32>
    %cst_134 = arith.constant dense<0.000000e+00> : vector<16x16xf32>
    %406 = tpu.matmul %403, %405, %cst_134 {dimension_numbers = #tpu.dot_dimension_numbers<[1], [0], [0], [1], [0, 0, 1, 1], [], []>} : vector<16x32xf32>, vector<32x16xf32>, vector<16x16xf32> -> vector<16x16xf32>
    %c1_135 = arith.constant 1 : index
    %c0_136 = arith.constant 0 : index
    %c0_137 = arith.constant 0 : index
    %407 = vector.load %arg13[%c1_135, %c0_136, %c0_137] : memref<2x1x16xf32, #tpu.memory_space<vmem>>, vector<1x1x16xf32>
    %408 = vector.shape_cast %407 : vector<1x1x16xf32> to vector<1x16xf32>
    %409 = vector.broadcast %408 : vector<1x16xf32> to vector<16x16xf32>
    %410 = arith.addf %406, %409 : vector<16x16xf32>
    %411 = arith.addf %410, %206 : vector<16x16xf32>
    %c0_138 = arith.constant 0 : index
    %c0_139 = arith.constant 0 : index
    %c0_140 = arith.constant 0 : index
    %412 = vector.load %arg14[%c0_138, %c0_139, %c0_140] : memref<1x16x16xf32, #tpu.memory_space<vmem>>, vector<1x16x16xf32>
    %413 = vector.shape_cast %412 : vector<1x16x16xf32> to vector<16x16xf32>
    %414 = vector.shape_cast %411 : vector<16x16xf32> to vector<1x16x16xf32>
    tpu.vector_store %arg14[%c0_138, %c0_139, %c0_140], %414 {strides = array<i32>} : memref<1x16x16xf32, #tpu.memory_space<vmem>>, vector<1x16x16xf32>,
    return
  }
  func.func @transform_0(%arg0: i32) -> (i32, i32, i32) {
    %c0_i32 = arith.constant 0 : i32
    %c0_i32_0 = arith.constant 0 : i32
    %c0_i32_1 = arith.constant 0 : i32
    return %arg0, %c0_i32, %c0_i32_0 : i32, i32, i32
  }
  func.func @transform_1(%arg0: i32) -> (i32, i32, i32) {
    %c0_i32 = arith.constant 0 : i32
    %c0_i32_0 = arith.constant 0 : i32
    %c0_i32_1 = arith.constant 0 : i32
    %c0_i32_2 = arith.constant 0 : i32
    return %c0_i32, %c0_i32_0, %c0_i32_1 : i32, i32, i32
  }
  func.func @transform_2(%arg0: i32) -> (i32, i32, i32) {
    %c0_i32 = arith.constant 0 : i32
    %c0_i32_0 = arith.constant 0 : i32
    %c0_i32_1 = arith.constant 0 : i32
    %c0_i32_2 = arith.constant 0 : i32
    return %c0_i32, %c0_i32_0, %c0_i32_1 : i32, i32, i32
  }
  func.func @transform_3(%arg0: i32) -> (i32, i32, i32) {
    %c0_i32 = arith.constant 0 : i32
    %c0_i32_0 = arith.constant 0 : i32
    %c0_i32_1 = arith.constant 0 : i32
    %c0_i32_2 = arith.constant 0 : i32
    return %c0_i32, %c0_i32_0, %c0_i32_1 : i32, i32, i32
  }
  func.func @transform_4(%arg0: i32) -> (i32, i32, i32) {
    %c0_i32 = arith.constant 0 : i32
    %c0_i32_0 = arith.constant 0 : i32
    %c0_i32_1 = arith.constant 0 : i32
    %c0_i32_2 = arith.constant 0 : i32
    return %c0_i32, %c0_i32_0, %c0_i32_1 : i32, i32, i32
  }
  func.func @transform_5(%arg0: i32) -> (i32, i32, i32) {
    %c0_i32 = arith.constant 0 : i32
    %c0_i32_0 = arith.constant 0 : i32
    %c0_i32_1 = arith.constant 0 : i32
    %c0_i32_2 = arith.constant 0 : i32
    return %c0_i32, %c0_i32_0, %c0_i32_1 : i32, i32, i32
  }
  func.func @transform_6(%arg0: i32) -> (i32, i32, i32) {
    %c0_i32 = arith.constant 0 : i32
    %c0_i32_0 = arith.constant 0 : i32
    %c0_i32_1 = arith.constant 0 : i32
    %c0_i32_2 = arith.constant 0 : i32
    return %c0_i32, %c0_i32_0, %c0_i32_1 : i32, i32, i32
  }
  func.func @transform_7(%arg0: i32) -> (i32, i32, i32) {
    %c0_i32 = arith.constant 0 : i32
    %c0_i32_0 = arith.constant 0 : i32
    %c0_i32_1 = arith.constant 0 : i32
    %c0_i32_2 = arith.constant 0 : i32
    return %c0_i32, %c0_i32_0, %c0_i32_1 : i32, i32, i32
  }
  func.func @transform_8(%arg0: i32) -> (i32, i32, i32) {
    %c0_i32 = arith.constant 0 : i32
    %c0_i32_0 = arith.constant 0 : i32
    %c0_i32_1 = arith.constant 0 : i32
    %c0_i32_2 = arith.constant 0 : i32
    return %c0_i32, %c0_i32_0, %c0_i32_1 : i32, i32, i32
  }
  func.func @transform_9(%arg0: i32) -> (i32, i32, i32) {
    %c0_i32 = arith.constant 0 : i32
    %c0_i32_0 = arith.constant 0 : i32
    %c0_i32_1 = arith.constant 0 : i32
    %c0_i32_2 = arith.constant 0 : i32
    return %c0_i32, %c0_i32_0, %c0_i32_1 : i32, i32, i32
  }
  func.func @transform_10(%arg0: i32) -> (i32, i32, i32) {
    %c0_i32 = arith.constant 0 : i32
    %c0_i32_0 = arith.constant 0 : i32
    %c0_i32_1 = arith.constant 0 : i32
    %c0_i32_2 = arith.constant 0 : i32
    return %c0_i32, %c0_i32_0, %c0_i32_1 : i32, i32, i32
  }
  func.func @transform_11(%arg0: i32) -> (i32, i32, i32) {
    %c0_i32 = arith.constant 0 : i32
    %c0_i32_0 = arith.constant 0 : i32
    %c0_i32_1 = arith.constant 0 : i32
    %c0_i32_2 = arith.constant 0 : i32
    return %c0_i32, %c0_i32_0, %c0_i32_1 : i32, i32, i32
  }
  func.func @transform_12(%arg0: i32) -> (i32, i32, i32) {
    %c0_i32 = arith.constant 0 : i32
    %c0_i32_0 = arith.constant 0 : i32
    %c0_i32_1 = arith.constant 0 : i32
    %c0_i32_2 = arith.constant 0 : i32
    return %c0_i32, %c0_i32_0, %c0_i32_1 : i32, i32, i32
  }
  func.func @transform_13(%arg0: i32) -> (i32, i32, i32) {
    %c0_i32 = arith.constant 0 : i32
    %c0_i32_0 = arith.constant 0 : i32
    %c0_i32_1 = arith.constant 0 : i32
    return %arg0, %c0_i32, %c0_i32_0 : i32, i32, i32
  }
}

</mosaic_0001>

<bundles_post_ra>
// kernel: tpu_custom_call.1
= control target key start
LH: loop header
LB: loop body
LE: loop exit
PB: predicated region body
PF: predicated region fallthrough
CT: control target
= control target key end

     0   :  { %s3594_s0 = inlined_call_operand.vmem [shape: f32[2,16,16], index: 0, kind: input, shape index: {}]   ;;  %s3595_s1 = inlined_call_operand.vmem [shape: f32[2,16,32], index: 1, kind: input, shape index: {}]   ;;  %s3596_s2 = inlined_call_operand.vmem [shape: f32[2,1,32], index: 2, kind: input, shape index: {}]   ;;  %s3597_s3 = inlined_call_operand.vmem [shape: f32[2,96,32], index: 3, kind: input, shape index: {}]   ;;  %s3598_s4 = inlined_call_operand.vmem [shape: f32[2,1,32], index: 4, kind: input, shape index: {}]   ;;  %s3599_s5 = inlined_call_operand.vmem [shape: f32[2,1,128], index: 5, kind: input, shape index: {}]   ;;  %s3600_s6 = inlined_call_operand.vmem [shape: f32[2,1,32], index: 6, kind: input, shape index: {}]   ;;  %s3601_s7 = inlined_call_operand.vmem [shape: f32[2,32,9], index: 7, kind: input, shape index: {}]   ;;  %s3602_s8 = inlined_call_operand.vmem [shape: f32[2,1,9], index: 8, kind: input, shape index: {}]   ;;  %s3603_s9 = inlined_call_operand.vmem [shape: f32[2,1,32], index: 9, kind: input, shape index: {}]   ;;  %s3604_s10 = inlined_call_operand.vmem [shape: f32[2,1,32], index: 10, kind: input, shape index: {}]   ;;  %s3605_s11 = inlined_call_operand.vmem [shape: f32[2,32,16], index: 11, kind: input, shape index: {}]   ;;  %s3606_s12 = inlined_call_operand.vmem [shape: f32[2,1,16], index: 12, kind: input, shape index: {}]   ;;  %s3607_s13 = inlined_call_operand.hbm [shape: f32[2,16,16], index: 13, kind: output, shape index: {}]  }
   0x1   :  { %3616 = sst [smem:[#allocation6_spill]] %s3594_s0 }
   0x2   :  { %3617 = sst [smem:[#allocation7_spill]] %s3595_s1 }
   0x3   :  { %18 = vsyncpa [#allocation3], 0 }
   0x4   :  { %20 = vsyncpa [#allocation3 + $0x1], 0  ;;  %s2986_s25 = smov 0   ;;  %s2988_s26 = smov 0  }
   0x5   :  { %s2990_s27 = smov 0   ;;  %s2992_s28 = smov 0  }
   0x6 LB: > { %s3007_s29 = sadd.s32 4294967295, %s2899_s28   ;;  %s2398_s30 = sadd.s32 4294967294, %s2899_s28   ;;  %s2899_s28 = sphi %s2992_s28, %s3631_s28   ;;  %s2895_s27 = sphi %s2990_s27, %s3630_s27   ;;  %s2891_s26 = sphi %s2988_s26, %s3629_s26   ;;  %s2887_s25 = sphi %s2986_s25, %s3628_s25  }
   0x7   : > { %s3011_s14 = sadd.s32 1, %s2899_s28   ;;  %s311_s15 = sadd.s32 1, %s2895_s27 }
   0x8   : > { %s308_s16 = ssub.s32 %s2899_s28, %s3011_s14  ;;  %p321_p0 = scmp.ne.s32.totalorder %s2895_s27, %s2891_s26 }
   0x9   : > { %p309_p1 = scmp.eq.s32.totalorder %s308_s16, 0  ;;  %p322_p2 = scmp.eq.s32.totalorder %s3007_s29, 1 }
   0xa   : > { %p327_p3 = scmp.ne.s32.totalorder %s2891_s26, %s2887_s25  ;;  %p328_p4 = scmp.eq.s32.totalorder %s2398_s30, 1 }
   0xb   : > { %s3022_s17 = scalar_select %p309_p1, %s2895_s27, %s311_s15  }
   0xc   : > { %p3024_p5 = por %p322_p2, %p321_p0  ;;  %p3028_p6 = por %p328_p4, %p327_p3 }
   0xd   : > { %3618 = sst [smem:[#allocation5_spill]] %s3022_s17  ;;  %p2401_p7 = scmp.ge.s32.totalorder %s2899_s28, 1 }
   0xe   : > { %p390_p8 = scmp.lt.s32.totalorder %s2899_s28, 3 }
  0x10   : > { %p391_p9 = pnand %p2401_p7, %p390_p8 }
  0x11   : > { %p434_p10 = scmp.lt.s32.totalorder (!%p391_p9), %s3007_s29, 1  ;;  %s3621_s0 = sld [smem:[#allocation6_spill]] (!%p391_p9) }
  0x12   : > { %394 = sbr.rel (%p391_p9) target bundleno = 4953 (0x1359), region = 72  ;;  %s3622_s1 = sld [smem:[#allocation7_spill]] (!%p391_p9) }
  0x13   : > { %s3608_s22 = smov (!%p391_p9), 64   ;;  %s3614_s16 = smov (!%p391_p9), 120  }
  0x17   : > { %s435_s20 = scalar_select %p434_p10, %s3007_s29, 1  ;;  %vm441_vm0 = vcmask 130048   ;;  %v619_v34 = vld [vmem:[%s3597_s3 + $0x58] sm:$0xff]  ;;  %v618_v35 = vld [vmem:[%s3597_s3 + $0x50] sm:$0xff]  ;;  %v617_v36 = vld [vmem:[%s3597_s3 + $0x48] sm:$0xff]  ;;  %vm576_vm1 = vcmask 1040384  }
  0x18   : > { %v485_v23 = vld [vmem:[%s3622_s1 + $0x8] sm:$0xff]  ;;  %v484_v25 = vld [vmem:[%s3622_s1] sm:$0xff]  ;;  %2559 = vmatprep.subr.mxu1 %v619_v34  ;;  %v615_v38 = vld [vmem:[%s3597_s3 + $0x38] sm:$0xff]  ;;  %vm583_vm2 = vcmask 1046528   ;;  %vm605_vm3 = vcmask 523264   ;;  %vm602_vm4 = vcmask 261120  }
  0x19   : > { %s2484_s21 = sshll.u32 %s435_s20, 4  ;;  %2552 = vmatprep.subr.mxu0 %v485_v23  ;;  %2560 = vmatpush3.msra.mxu1 %v619_v34  ;;  %v616_v37 = vld [vmem:[%s3597_s3 + $0x40] sm:$0xff]  ;;  %v614_v39 = vld [vmem:[%s3597_s3 + $0x30] sm:$0xff]  ;;  %v613_v40 = vld [vmem:[%s3597_s3 + $0x28] sm:$0xff]  ;;  %vm627_vm5 = vcmask 785408   ;;  %vm858_vm6 = vcmask 7168  }
  0x1a   : > { %s438_s24 = scalar_lea.vmem %s3621_s0, %s2484_s21  ;;  %2553 = vmatpush3.msra.mxu0 %v485_v23  ;;  %2561 = vmatprep.subr.mxu1 %v618_v35  ;;  %v612_v41 = vld [vmem:[%s3597_s3 + $0x20] sm:$0xff]  ;;  %v611_v42 = vld [vmem:[%s3597_s3 + $0x18] sm:$0xff]  ;;  %v610_v43 = vld [vmem:[%s3597_s3 + $0x10] sm:$0xff]  ;;  %s3610_s21 = smov 32   ;;  %vm1114_vm11 = vcmask 1041408   ;;  %vm1137_vm12 = vcmask 1043456  }
  0x1b   : > { %v3039_v0 = vld [vmem:[%s438_s24] sm:$0xff]  ;;  %v3041_v1 = vld [vmem:[%s438_s24 + $0x8] sm:$0xff]  ;;  %2554 = vmatprep.subr.mxu0 %v484_v25  ;;  %2562 = vmatpush3.msra.mxu1 %v618_v35 }
  0x1c   : > { %v442_v2 = vsel %vm441_vm0, %v3039_v0, 0.0  ;;  %v443_v3 = vsel %vm441_vm0, %v3041_v1, 0.0  ;;  %2555 = vmatpush3.msra.mxu0 %v484_v25  ;;  %2563 = vmatprep.subr.mxu1 %v617_v36  ;;  %v609_v44 = vld [vmem:[%s3597_s3 + $0x8] sm:$0xff]  ;;  %v608_v45 = vld [vmem:[%s3597_s3] sm:$0xff] }
  0x1d   : > { %v444_v4 = vadd.f32 %v443_v3, %v442_v2  ;;  %2564 = vmatpush3.msra.mxu1 %v617_v36  ;;  %v2405_v46 = vld [vmem:[%s3596_s2] ss:$0 sm:$0xff] }
  0x1e   : > { %2565 = vmatprep.subr.mxu1 %v616_v37 }
  0x1f   : > { %445 = vadd.xlane.f32.xlu0 %v444_v4  ;;  %2566 = vmatpush3.msra.mxu1 %v616_v37 }
  0x20   : > { %2567 = vmatprep.subr.mxu1 %v615_v38 }
  0x21   : > { %2568 = vmatpush3.msra.mxu1 %v615_v38 }
  0x22   : > { %2569 = vmatprep.subr.mxu1 %v614_v39 }
  0x23   : > { %2570 = vmatpush3.msra.mxu1 %v614_v39 }
  0x24   : > { %2571 = vmatprep.subr.mxu1 %v613_v40 }
  0x25   : > { %2572 = vmatpush3.msra.mxu1 %v613_v40 }
  0x26   : > { %2573 = vmatprep.subr.mxu1 %v612_v41 }
  0x27   : > { %2574 = vmatpush3.msra.mxu1 %v612_v41 }
  0x28   : > { %2575 = vmatprep.subr.mxu1 %v611_v42 }
  0x29   : > { %2576 = vmatpush3.msra.mxu1 %v611_v42 }
  0x2a   : > { %2577 = vmatprep.subr.mxu1 %v610_v43 }
  0x2b   : > { %2578 = vmatpush3.msra.mxu1 %v610_v43 }
  0x2c   : > { %2579 = vmatprep.subr.mxu1 %v609_v44 }
  0x2d   : > { %2580 = vmatpush3.msra.mxu1 %v609_v44 }
  0x2e   : > { %2581 = vmatprep.subr.mxu1 %v608_v45 }
  0x2f   : > { %2582 = vmatpush3.msra.mxu1 %v608_v45 }
  0xa8   : > { %v446_v5 = vpop.xlane.xlu0 %445 }
  0xa9   : > { %v447_v6 = vrot.slane %v446_v5, 4 }
  0xab   : > { %v448_v7 = vadd.f32 %v447_v6, %v446_v5  ;;  %v755_v5 = vld [vmem:[%s3601_s7 + $0x18] sm:$0xff]  ;;  %v754_v6 = vld [vmem:[%s3601_s7 + $0x10] sm:$0xff] }
  0xac   : > { %2586 = vmatprep.subr.mxu0 %v755_v5 }
  0xad   : > { %v449_v8 = vrot.slane %v448_v7, 2 }
  0xaf   : > { %v450_v9 = vadd.f32 %v449_v8, %v448_v7  ;;  %v753_v7 = vld [vmem:[%s3601_s7 + $0x8] sm:$0xff]  ;;  %v752_v8 = vld [vmem:[%s3601_s7] sm:$0xff] }
  0xb1   : > { %v451_v10 = vrot.slane %v450_v9, 1 }
  0xb3   : > { %v452_v11 = vadd.f32 %v451_v10, %v450_v9  ;;  %v2408_v9 = vld [vmem:[%s3598_s4] ss:$0 sm:$0xff] }
  0xb5   : > { %2674 = vpush %v452_v11 }
  0xe6   : > { %s2675_s30 = spop %2674 }
  0xe7   : > { %s456_s15 = smul.f32 0.00390625, %s2675_s30 }
  0xe9   : > { %v457_v12 = vstv %s456_s15 }
  0xea   : > { %v458_v13 = vsub.f32 %v3039_v0, %v457_v12  ;;  %v459_v14 = vsub.f32 %v3041_v1, %v457_v12 }
  0xec   : > { %v460_v15 = vmul.f32 %v458_v13, %v458_v13  ;;  %v461_v16 = vmul.f32 %v459_v14, %v459_v14 }
  0xee   : > { %v462_v17 = vsel %vm441_vm0, %v460_v15, 0.0  ;;  %v463_v18 = vsel %vm441_vm0, %v461_v16, 0.0 }
  0xef   : > { %v464_v19 = vadd.f32 %v463_v18, %v462_v17 }
  0xf1   : > { %465 = vadd.xlane.f32.xlu0 %v464_v19 }
 0x17a   : > { %v466_v20 = vpop.xlane.xlu0 %465 }
 0x17b   : > { %v467_v21 = vrot.slane %v466_v20, 4 }
 0x17d   : > { %v468_v22 = vadd.f32 %v467_v21, %v466_v20 }
 0x17f   : > { %v469_v24 = vrot.slane %v468_v22, 2 }
 0x181   : > { %v470_v26 = vadd.f32 %v469_v24, %v468_v22 }
 0x183   : > { %v471_v27 = vrot.slane %v470_v26, 1 }
 0x185   : > { %v472_v28 = vadd.f32 %v471_v27, %v470_v26 }
 0x187   : > { %2676 = vpush %v472_v28 }
 0x1b8   : > { %s2677_s23 = spop %2676 }
 0x1b9   : > { %s476_s24 = smul.f32 0.00390625, %s2677_s23 }
 0x1bb   : > { %s477_s30 = sadd.f32 1e-05, %s476_s24  ;;  %s3623_s24 = smov 32  }
 0x1bd   : > { %v478_v29 = vstv %s477_s30  ;;  %s3626_s30 = smov 96  }
 0x1be   : > { %2767 = vrsqrt.f32 %v478_v29 }
 0x1cb   : > { %v2768_v30 = vpop.eup %2767 }
 0x1cc   : > { %2678 = vpush %v2768_v30 }
 0x1fd   : > { %s2679_s15 = spop %2678 }
 0x1fe   : > { %v481_v31 = vstv %s2679_s15  ;;  %s431_s15 = sand.u32 1, %s2891_s26  }
 0x1ff   : > { %v483_v32 = vmul.f32 %v481_v31, %v459_v14  ;;  %v482_v33 = vmul.f32 %v481_v31, %v458_v13 }
 0x201   : > { %2556 = vmatprep.mubr.msk.f32.mxu0 %vm441_vm0, %v482_v33 }
 0x202   : > { %2557 = vmatmul.mubr.msk.f32.vlgmr.msra.gmra.mxu0 %vm441_vm0, %v483_v32 }
 0x203   : > { %2587 = vmatpush3.msra.mxu0 %v755_v5 }
 0x204   : > { %2588 = vmatprep.subr.mxu0 %v754_v6 }
 0x205   : > { %2589 = vmatpush3.msra.mxu0 %v754_v6 }
 0x206   : > { %2590 = vmatprep.subr.mxu0 %v753_v7 }
 0x207   : > { %2591 = vmatpush3.msra.mxu0 %v753_v7 }
 0x208   : > { %2592 = vmatprep.subr.mxu0 %v752_v8 }
 0x209   : > { %2593 = vmatpush3.msra.mxu0 %v752_v8 }
 0x2c2   : > { %v2558_v47 = vpop.f32.mrf.mxu0 }
 0x2c3   : > { %v3098_v48 = vadd.f32 %v2558_v47, %v2405_v46 }
 0x2c4   : > { %v565_v49 = vpop.f32.mrf.mxu0 }
 0x2c5   : > { %v3100_v50 = vadd.f32 %v2405_v46, %v565_v49  ;;  %591 = vrot.lane.b32.xlu1 %v3098_v48, %s3610_s21  ;;  %v585_v52 = vrot.slane %v3098_v48, 1  ;;  %v578_v54 = vrot.slane %v3098_v48, 7 }
 0x2c7   : > { %v584_v51 = vrot.slane %v3100_v50, 1  ;;  %v577_v53 = vrot.slane %v3100_v50, 7  ;;  %v588_v57 = vsel %vm583_vm2, %v585_v52, 0.0 }
 0x2c9   : > { %589 = vrot.lane.b32.xlu1 %v3100_v50, %s3610_s21  ;;  %v586_v55 = vsel %vm583_vm2, %v584_v51, %v585_v52  ;;  %v579_v56 = vsel %vm576_vm1, %v577_v53, %v578_v54  ;;  %v582_v60 = vsel %vm576_vm1, 0.0, %v577_v53  ;;  %v2903_v54 = vmov 3   ;;  %s3624_s21 = smov 64  }
 0x2ca   : > { %596 = vrot.lane.b32.xlu0 %v586_v55, %s3608_s22  ;;  %v2904_v55 = vmov 1  }
 0x2cb   : > { %2741 = vset.pattern.permute.xlu0 %v2903_v54  ;;  %2739 = vset.pattern.permute.xlu1 %v2904_v55 }
 0x2cd   : > { %598 = vrot.lane.b32.xlu1 %v588_v57, %s3608_s22  ;;  %s3612_s22 = smov 96  }
 0x337   : > { %v592_v58 = vpop.permute.xlu1 %591 }
 0x338   : > { %v604_v2 = vsel %vm602_vm4, %v579_v56, %v592_v58  ;;  %v844_v56 = vld [vmem:[%s3603_s9] sm:$0x1] }
 0x339   : > { %2597 = vmatprep.subr.msk.mxu0 %vm576_vm1, %v844_v56  ;;  %v2413_v58 = vld [vmem:[%s3602_s8] ss:$0 sm:$0xff] }
 0x33b   : > { %v590_v59 = vpop.permute.xlu1 %589 }
 0x33c   : > { %v603_v61 = vsel %vm602_vm4, %v582_v60, %v590_v59  ;;  %v597_v62 = vpop.permute.xlu0 %596 }
 0x33d   : > { %v606_v63 = vsel %vm605_vm3, %v603_v61, %v597_v62  ;;  %v2906_v62 = vmov 2  }
 0x33e   : > { %2583 = vmatprep.mubr.msk.f32.mxu1 %vm627_vm5, %v606_v63 }
 0x33f   : > { %v599_v3 = vpop.permute.xlu1 %598 }
 0x340   : > { %v607_v4 = vsel %vm605_vm3, %v604_v2, %v599_v3  ;;  %v2907_v3 = vmov 0  }
 0x341   : > { %2584 = vmatmul.mubr.msk.f32.vlgmr.msra.gmra.mxu1 %vm627_vm5, %v607_v4  ;;  %v2416_v4 = vld [vmem:[%s3604_s10] ss:$0 sm:$0xff] }
 0x401   : > { %v2585_v10 = vpop.f32.mrf.mxu1 }
 0x402   : > { %v706_v11 = vadd.f32 %v2585_v10, %v2408_v9 }
 0x403   : > { %v700_v12 = vpop.f32.mrf.mxu1 }
 0x404   : > { %v701_v13 = vadd.f32 %v2408_v9, %v700_v12  ;;  %v710_v14 = vsel %vm602_vm4, %v706_v11, 0.0 }
 0x406   : > { %v709_v15 = vsel %vm602_vm4, %v701_v13, 0.0 }
 0x407   : > { %v711_v16 = vadd.f32 %v710_v14, %v709_v15 }
 0x409   : > { %v712_v17 = vrot.slane %v711_v16, 4 }
 0x40b   : > { %v713_v18 = vadd.f32 %v712_v17, %v711_v16 }
 0x40d   : > { %v714_v19 = vrot.slane %v713_v18, 2 }
 0x40f   : > { %v715_v20 = vadd.f32 %v714_v19, %v713_v18 }
 0x411   : > { %v716_v21 = vrot.slane %v715_v20, 1 }
 0x413   : > { %v717_v22 = vadd.f32 %v716_v21, %v715_v20 }
 0x415   : > { %v719_v23 = vmul.f32 0.0625, %v717_v22 }
 0x417   : > { %v720_v24 = vsub.f32 %v701_v13, %v719_v23  ;;  %v721_v25 = vsub.f32 %v706_v11, %v719_v23 }
 0x419   : > { %v722_v26 = vmul.f32 %v720_v24, %v720_v24  ;;  %v723_v27 = vmul.f32 %v721_v25, %v721_v25 }
 0x41b   : > { %v724_v28 = vsel %vm602_vm4, %v722_v26, 0.0  ;;  %v725_v29 = vsel %vm602_vm4, %v723_v27, 0.0 }
 0x41c   : > { %v726_v30 = vadd.f32 %v725_v29, %v724_v28 }
 0x41e   : > { %v727_v31 = vrot.slane %v726_v30, 4 }
 0x420   : > { %v728_v32 = vadd.f32 %v727_v31, %v726_v30 }
 0x422   : > { %v729_v33 = vrot.slane %v728_v32, 2 }
 0x424   : > { %v730_v34 = vadd.f32 %v729_v33, %v728_v32 }
 0x426   : > { %v731_v35 = vrot.slane %v730_v34, 1 }
 0x428   : > { %v732_v36 = vadd.f32 %v731_v35, %v730_v34 }
 0x42a   : > { %v733_v37 = vmul.f32 0.0625, %v732_v36 }
 0x42c   : > { %v734_v38 = vadd.f32 1e-05, %v733_v37 }
 0x42e   : > { %2769 = vrsqrt.f32 %v734_v38 }
 0x43b   : > { %v2770_v39 = vpop.eup %2769 }
 0x43c   : > { %v736_v40 = vmul.f32 %v2770_v39, %v720_v24  ;;  %v737_v41 = vmul.f32 %v2770_v39, %v721_v25 }
 0x43e   : > { %v2411_v42 = vmul.f32 -1.442695, %v736_v40  ;;  %v2412_v43 = vmul.f32 -1.442695, %v737_v41 }
 0x440   : > { %2771 = vpow2.f32 %v2411_v42 }
 0x441   : > { %2773 = vpow2.f32 %v2412_v43 }
 0x44d   : > { %v2772_v44 = vpop.eup %2771 }
 0x44e   : > { %v2774_v45 = vpop.eup %2773  ;;  %v744_v46 = vadd.f32 1.0, %v2772_v44 }
 0x44f   : > { %v745_v47 = vadd.f32 1.0, %v2774_v45 }
 0x450   : > { %2775 = vrcp.f32 %v744_v46 }
 0x451   : > { %2777 = vrcp.f32 %v745_v47 }
 0x45d   : > { %v2776_v49 = vpop.eup %2775 }
 0x45e   : > { %v2778_v51 = vpop.eup %2777  ;;  %v3141_v52 = vmul.f32 %v2776_v49, %v736_v40  ;;  %v2909_v49 = vmov 5  }
 0x45f   : > { %v3143_v53 = vmul.f32 %v2778_v51, %v737_v41 }
 0x460   : > { %2594 = vmatprep.mubr.msk.f32.mxu0 %vm602_vm4, %v3141_v52 }
 0x461   : > { %2595 = vmatmul.mubr.msk.f32.vlgmr.msra.gmra.mxu0 %vm602_vm4, %v3143_v53 }
 0x462   : > { %2598 = vmatpush3.msk.msra.mxu0 %vm576_vm1, %v844_v56 }
 0x521   : > { %v2596_v57 = vpop.f32.mrf.mxu0 }
 0x522   : > { %v3164_v61 = vadd.f32 %v2596_v57, %v2413_v58 }
 0x523   : > { %v835_v59 = vpop.f32.mrf.mxu0 }
 0x524   : > { %v3159_v60 = vadd.f32 %v2413_v58, %v835_v59 }
 0x526   : > { %1051 = vperm.xlu0 %2741, %v3159_v60   ;;  %854 = vrot.lane.b32.xlu1 %v3159_v60, %s3614_s16 }
 0x52a   : > { %856 = vrot.lane.b32.xlu1 %v3164_v61, %s3614_s16  ;;  %2743 = vset.pattern.permute.xlu0 %v2907_v3 }
 0x52e   : > { %1035 = vperm.xlu1 %2739, %v3164_v61  }
 0x532   : > { %1031 = vperm.xlu1 %2739, %v3159_v60  }
 0x536   : > { %2740 = vset.pattern.permute.xlu1 %v2906_v62 }
 0x537   : > { %1041 = vperm.xlu1 %2740, %v3159_v60  }
 0x53b   : > { %1045 = vperm.xlu1 %2740, %v3164_v61  }
 0x53f   : > { %2742 = vset.pattern.permute.xlu1 %v2903_v54 }
 0x540   : > { %1055 = vperm.xlu1 %2742, %v3164_v61  }
 0x544   : > { %2744 = vset.pattern.permute.xlu1 %v2907_v3 }
 0x598   : > { %v855_v63 = vpop.permute.xlu1 %854 }
 0x599   : > { %2599 = vmatprep.mubr.msk.f32.mxu0 %vm858_vm6, %v855_v63  ;;  %v2910_v63 = vmov 7  }
 0x59c   : > { %v857_v2 = vpop.permute.xlu1 %856 }
 0x59d   : > { %2600 = vmatmul.mubr.msk.f32.vlgmr.msra.gmra.mxu0 %vm858_vm6, %v857_v2  ;;  %v2911_v2 = vmov 6  }
 0x5a1   : > { %v1052_v47 = vpop.permute.xlu0 %1051 }
 0x5a9   : > { %v1036_v33 = vpop.permute.xlu1 %1035 }
 0x5ad   : > { %v1032_v40 = vpop.permute.xlu1 %1031 }
 0x5b2   : > { %v1042_v41 = vpop.permute.xlu1 %1041 }
 0x5b6   : > { %v1046_v45 = vpop.permute.xlu1 %1045 }
 0x5bb   : > { %v1056_v57 = vpop.permute.xlu1 %1055 }
 0x65d   : > { %v2601_v5 = vpop.f32.mrf.mxu0 }
 0x65e   : > { %v938_v6 = vadd.f32 %v2601_v5, %v2416_v4 }
 0x65f   : > { %v932_v7 = vpop.f32.mrf.mxu0 }
 0x660   : > { %v948_v8 = vand.u32 2147483647, %v938_v6  ;;  %v933_v9 = vadd.f32 %v2416_v4, %v932_v7  ;;  %v942_v29 = vmax.f32 %v938_v6, 0.0  ;;  %vm944_vm9 = vcmp.ne.f32.partialorder %v938_v6, %v938_v6 }
 0x661   : > { %v2912_v4 = vmov 4  }
 0x662   : > { %v950_v10 = vsub.f32 0.0, %v948_v8  ;;  %v947_v11 = vand.u32 2147483647, %v933_v9  ;;  %v941_v34 = vmax.f32 %v933_v9, 0.0  ;;  %vm943_vm10 = vcmp.ne.f32.partialorder %v933_v9, %v933_v9 }
 0x664   : > { %v953_v12 = vmul.f32 1.442695, %v950_v10  ;;  %v949_v13 = vsub.f32 0.0, %v947_v11  ;;  %v2420_v11 = vld [vmem:[%s3599_s5] ss:$0 sm:$0xff] }
 0x666   : > { %2779 = vpow2.f32 %v953_v12  ;;  %v951_v14 = vmul.f32 1.442695, %v949_v13 }
 0x668   : > { %2781 = vpow2.f32 %v951_v14 }
 0x673   : > { %v2780_v15 = vpop.eup %2779 }
 0x674   : > { %v964_v16 = vadd.f32 1.0, %v2780_v15  ;;  %v967_v19 = vmul.f32 -0.5, %v2780_v15  ;;  %v970_v22 = vand.u32 2147483647, %v2780_v15 }
 0x675   : > { %v2782_v17 = vpop.eup %2781 }
 0x676   : > { %2783 = vlog2.f32 %v964_v16  ;;  %v955_v18 = vadd.f32 1.0, %v2782_v17  ;;  %v958_v20 = vmul.f32 -0.5, %v2782_v17  ;;  %v968_v21 = vadd.f32 1.0, %v967_v19 }
 0x677   : > { %v961_v25 = vand.u32 2147483647, %v2782_v17  ;;  %vm971_vm7 = vcmp.lt.f32.partialorder %v970_v22, 0.0004427343 }
 0x678   : > { %2785 = vlog2.f32 %v955_v18  ;;  %v959_v23 = vadd.f32 1.0, %v958_v20  ;;  %v969_v27 = vmul.f32 %v2780_v15, %v968_v21 }
 0x679   : > { %vm962_vm8 = vcmp.lt.f32.partialorder %v961_v25, 0.0004427343 }
 0x67a   : > { %v960_v32 = vmul.f32 %v2782_v17, %v959_v23 }
 0x683   : > { %v2784_v24 = vpop.eup %2783 }
 0x684   : > { %v966_v26 = vmul.f32 0.6931472, %v2784_v24 }
 0x685   : > { %v2786_v28 = vpop.eup %2785 }
 0x686   : > { %v972_v30 = vsel %vm971_vm7, %v969_v27, %v966_v26  ;;  %v957_v31 = vmul.f32 0.6931472, %v2786_v28 }
 0x687   : > { %v974_v35 = vadd.f32 %v972_v30, %v942_v29 }
 0x688   : > { %v963_v36 = vsel %vm962_vm8, %v960_v32, %v957_v31 }
 0x689   : > { %v976_v37 = vsel %vm944_vm9, %v938_v6, %v974_v35  ;;  %v973_v38 = vadd.f32 %v963_v36, %v941_v34 }
 0x68a   : > { %981 = vrot.lane.b32.xlu0 %v976_v37, %s3623_s24  ;;  %v3193_v43 = vmul.f32 %v976_v37, %v3143_v53 }
 0x68b   : > { %v975_v39 = vsel %vm943_vm10, %v933_v9, %v973_v38 }
 0x68c   : > { %985 = vrot.lane.b32.xlu1 %v975_v39, %s3624_s21  ;;  %v3189_v42 = vmul.f32 %v975_v39, %v3141_v52  ;;  %v1039_v46 = vmul.f32 %v1036_v33, %v3193_v43  ;;  %v1059_v58 = vmul.f32 %v1056_v57, %v3193_v43  ;;  %v1049_v59 = vmul.f32 %v1046_v45, %v3193_v43 }
 0x68e   : > { %979 = vrot.lane.b32.xlu0 %v975_v39, %s3623_s24  ;;  %v1048_v44 = vmul.f32 %v1042_v41, %v3189_v42  ;;  %v1058_v51 = vmul.f32 %v1052_v47, %v3189_v42  ;;  %v1038_v56 = vmul.f32 %v1032_v40, %v3189_v42 }
 0x690   : > { %991 = vrot.lane.b32.xlu1 %v975_v39, %s3612_s22 }
 0x692   : > { %987 = vrot.lane.b32.xlu0 %v976_v37, %s3624_s21 }
 0x694   : > { %993 = vrot.lane.b32.xlu1 %v976_v37, %s3612_s22 }
 0x696   : > { %1021 = vperm.xlu0 %2743, %v3159_v60  }
 0x698   : > { %1025 = vperm.xlu1 %2744, %v3164_v61  }
 0x69a   : > { %1070 = vrot.lane.b32.xlu0 %v1048_v44, %s3624_s21 }
 0x69b   : > { %2746 = vset.pattern.permute.xlu0 %v2909_v49 }
 0x69c   : > { %1064 = vrot.lane.b32.xlu1 %v1039_v46, %s3623_s24 }
 0x69d   : > { %2745 = vset.pattern.permute.xlu1 %v2909_v49 }
 0x69e   : > { %1078 = vrot.lane.b32.xlu0 %v1058_v51, %s3612_s22 }
 0x6a0   : > { %1062 = vrot.lane.b32.xlu1 %v1038_v56, %s3623_s24 }
 0x6a2   : > { %1080 = vrot.lane.b32.xlu0 %v1059_v58, %s3612_s22 }
 0x6a4   : > { %1072 = vrot.lane.b32.xlu1 %v1049_v59, %s3624_s21 }
 0x6a6   : > { %1177 = vperm.xlu0 %2746, %v3164_v61  }
 0x6a8   : > { %1173 = vperm.xlu1 %2745, %v3159_v60  }
 0x6aa   : > { %2748 = vset.pattern.permute.xlu0 %v2910_v63 }
 0x6ab   : > { %1213 = vperm.xlu0 %2748, %v3159_v60  }
 0x6ac   : > { %2747 = vset.pattern.permute.xlu1 %v2911_v2 }
 0x6ad   : > { %1193 = vperm.xlu1 %2747, %v3159_v60  }
 0x6af   : > { %2751 = vset.pattern.permute.xlu0 %v2912_v4 }
 0x6b0   : > { %1167 = vperm.xlu0 %2751, %v3164_v61  }
 0x6b1   : > { %1197 = vperm.xlu1 %2747, %v3164_v61  }
 0x6b4   : > { %2753 = vset.pattern.permute.xlu0 %v2904_v55 }
 0x6b5   : > { %2749 = vset.pattern.permute.xlu1 %v2910_v63 }
 0x6b6   : > { %1217 = vperm.xlu1 %2749, %v3164_v61  }
 0x6ba   : > { %2750 = vset.pattern.permute.xlu1 %v2912_v4 }
 0x6bb   : > { %1163 = vperm.xlu1 %2750, %v3159_v60  }
 0x6bf   : > { %2752 = vset.pattern.permute.xlu1 %v2904_v55 }
 0x6fc   : > { %v982_v5 = vpop.permute.xlu0 %981 }
 0x6fd   : > { %v998_v12 = vsel %vm602_vm4, %v976_v37, %v982_v5 }
 0x6fe   : > { %v986_v6 = vpop.permute.xlu1 %985 }
 0x700   : > { %v980_v7 = vpop.permute.xlu0 %979 }
 0x701   : > { %v997_v8 = vsel %vm602_vm4, %v975_v39, %v980_v7 }
 0x702   : > { %v999_v9 = vsel %vm605_vm3, %v997_v8, %v986_v6  ;;  %v992_v10 = vpop.permute.xlu1 %991 }
 0x703   : > { %v1001_v61 = vsel %vm627_vm5, %v999_v9, %v992_v10 }
 0x704   : > { %v1003_v13 = vsub.f32 0.0, %v1001_v61  ;;  %v988_v60 = vpop.permute.xlu0 %987 }
 0x705   : > { %v1000_v55 = vsel %vm605_vm3, %v998_v12, %v988_v60 }
 0x706   : > { %v1012_v14 = vmul.f32 %v2420_v11, %v1003_v13  ;;  %v994_v15 = vpop.permute.xlu1 %993 }
 0x707   : > { %v1002_v16 = vsel %vm627_vm5, %v1000_v55, %v994_v15 }
 0x708   : > { %v1014_v17 = vmul.f32 1.442695, %v1012_v14  ;;  %v1004_v18 = vsub.f32 0.0, %v1002_v16 }
 0x70a   : > { %2787 = vpow2.f32 %v1014_v17  ;;  %v1013_v19 = vmul.f32 %v2420_v11, %v1004_v18 }
 0x70c   : > { %v1016_v20 = vmul.f32 1.442695, %v1013_v19 }
 0x70e   : > { %2789 = vpow2.f32 %v1016_v20 }
 0x711   : > { %v1022_v21 = vpop.permute.xlu0 %1021 }
 0x712   : > { %v1028_v27 = vmul.f32 %v1022_v21, %v3189_v42 }
 0x713   : > { %v1026_v22 = vpop.permute.xlu1 %1025 }
 0x714   : > { %v1029_v35 = vmul.f32 %v1026_v22, %v3193_v43 }
 0x715   : > { %v1071_v23 = vpop.permute.xlu0 %1070 }
 0x717   : > { %v2788_v24 = vpop.eup %2787  ;;  %v1065_v25 = vpop.permute.xlu1 %1064 }
 0x718   : > { %v1092_v26 = vrot.slane %v2788_v24, 7  ;;  %v1085_v40 = vsel %vm602_vm4, %v1029_v35, %v1065_v25 }
 0x719   : > { %v1079_v28 = vpop.permute.xlu0 %1078 }
 0x71a   : > { %v1097_v29 = vsel %vm576_vm1, 1.0, %v1092_v26 }
 0x71b   : > { %v2790_v30 = vpop.eup %2789  ;;  %v1110_v31 = vmul.f32 %v2788_v24, %v1097_v29  ;;  %v1063_v32 = vpop.permute.xlu1 %1062 }
 0x71c   : > { %v1084_v33 = vsel %vm602_vm4, %v1028_v27, %v1063_v32  ;;  %v1093_v34 = vrot.slane %v2790_v30, 7 }
 0x71d   : > { %v1115_v36 = vrot.slane %v1110_v31, 6  ;;  %v1086_v37 = vsel %vm605_vm3, %v1084_v33, %v1071_v23  ;;  %v1081_v46 = vpop.permute.xlu0 %1080 }
 0x71e   : > { %v1088_v38 = vsel %vm627_vm5, %v1086_v37, %v1079_v28  ;;  %v1094_v39 = vsel %vm576_vm1, %v1092_v26, %v1093_v34 }
 0x71f   : > { %v1100_v41 = vrot.slane %v1088_v38, 7  ;;  %v1111_v42 = vmul.f32 %v2790_v30, %v1094_v39  ;;  %v1073_v44 = vpop.permute.xlu1 %1072  ;;  %v1120_v45 = vsel %vm1114_vm11, 1.0, %v1115_v36 }
 0x720   : > { %v1087_v47 = vsel %vm605_vm3, %v1085_v40, %v1073_v44  ;;  %v1133_v59 = vmul.f32 %v1120_v45, %v1110_v31 }
 0x721   : > { %v1105_v43 = vsel %vm576_vm1, 0.0, %v1100_v41  ;;  %v1116_v51 = vrot.slane %v1111_v42, 6  ;;  %v1089_v56 = vsel %vm627_vm5, %v1087_v47, %v1081_v46  ;;  %v2422_v47 = vmul.f32 -1.442695, %v3100_v50 }
 0x722   : > { %v1106_v57 = vmul.f32 %v2788_v24, %v1105_v43  ;;  %v1101_v58 = vrot.slane %v1089_v56, 7  ;;  %v1138_v61 = vrot.slane %v1133_v59, 4  ;;  %v2423_v43 = vmul.f32 -1.442695, %v3098_v48 }
 0x723   : > { %v1117_v6 = vsel %vm1114_vm11, %v1115_v36, %v1116_v51  ;;  %v1174_v23 = vpop.permute.xlu1 %1173  ;;  %2791 = vpow2.f32 %v2422_v47 }
 0x724   : > { %v1108_v5 = vadd.f32 %v1106_v57, %v1088_v38  ;;  %v1102_v7 = vsel %vm576_vm1, %v1100_v41, %v1101_v58  ;;  %v1134_v10 = vmul.f32 %v1117_v6, %v1111_v42  ;;  %v1143_v16 = vsel %vm1137_vm12, 1.0, %v1138_v61 }
 0x725   : > { %v1107_v8 = vmul.f32 %v2790_v30, %v1102_v7  ;;  %v1156_v20 = vmul.f32 %v1143_v16, %v1133_v59  ;;  %2793 = vpow2.f32 %v2423_v43 }
 0x726   : > { %v1123_v9 = vrot.slane %v1108_v5, 6  ;;  %v1139_v15 = vrot.slane %v1134_v10, 4 }
 0x727   : > { %v1109_v11 = vadd.f32 %v1107_v8, %v1089_v56  ;;  %v1158_v29 = vmul.f32 0.0, %v1156_v20 }
 0x728   : > { %v1128_v12 = vsel %vm1114_vm11, 0.0, %v1123_v9  ;;  %v1140_v22 = vsel %vm1137_vm12, %v1138_v61, %v1139_v15  ;;  %v1194_v35 = vpop.permute.xlu1 %1193 }
 0x729   : > { %v1129_v13 = vmul.f32 %v1128_v12, %v1110_v31  ;;  %v1124_v60 = vrot.slane %v1109_v11, 6  ;;  %v1157_v28 = vmul.f32 %v1140_v22, %v1134_v10  ;;  %v1178_v31 = vpop.permute.xlu0 %1177 }
 0x72b   : > { %v1131_v55 = vadd.f32 %v1129_v13, %v1108_v5  ;;  %v1125_v14 = vsel %vm1114_vm11, %v1123_v9, %v1124_v60 }
 0x72c   : > { %v1130_v17 = vmul.f32 %v1125_v14, %v1111_v42  ;;  %v1198_v42 = vpop.permute.xlu1 %1197 }
 0x72d   : > { %v1146_v18 = vrot.slane %v1131_v55, 4  ;;  %v1214_v40 = vpop.permute.xlu0 %1213 }
 0x72e   : > { %v1132_v19 = vadd.f32 %v1130_v17, %v1109_v11 }
 0x72f   : > { %v1151_v21 = vsel %vm1137_vm12, 0.0, %v1146_v18 }
 0x730   : > { %v1152_v24 = vmul.f32 %v1151_v21, %v1133_v59  ;;  %v1147_v25 = vrot.slane %v1132_v19, 4  ;;  %v2792_v51 = vpop.eup %2791 }
 0x731   : > { %v1218_v45 = vpop.permute.xlu1 %1217  ;;  %v1249_v56 = vadd.f32 1.0, %v2792_v51  ;;  %v1168_v59 = vpop.permute.xlu0 %1167 }
 0x732   : > { %v1154_v26 = vadd.f32 %v1152_v24, %v1131_v55  ;;  %v1148_v27 = vsel %vm1137_vm12, %v1146_v18, %v1147_v25  ;;  %v2794_v57 = vpop.eup %2793 }
 0x733   : > { %v1153_v30 = vmul.f32 %v1148_v27, %v1134_v10  ;;  %2795 = vrcp.f32 %v1249_v56  ;;  %v1250_v58 = vadd.f32 1.0, %v2794_v57  ;;  %v2421_v10 = vld [vmem:[%s3600_s6] ss:$0 sm:$0xff] }
 0x734   : > { %v1159_v32 = vmul.f32 %v1157_v28, %v1154_v26  ;;  %v1160_v33 = vadd.f32 %v1158_v29, %v1154_v26  ;;  %v1239_v60 = vmul.f32 %v2421_v10, %v3141_v52  ;;  %v1240_v24 = vmul.f32 %v2421_v10, %v3143_v53  ;;  %v2424_v57 = vld [vmem:[%s3606_s12] ss:$0 sm:$0xff] }
 0x735   : > { %v1155_v34 = vadd.f32 %v1153_v30, %v1132_v19  ;;  %2797 = vrcp.f32 %v1250_v58 }
 0x736   : > { %v1180_v36 = vmul.f32 %v1174_v23, %v1160_v33  ;;  %v1200_v37 = vmul.f32 %v1194_v35, %v1160_v33  ;;  %v1220_v41 = vmul.f32 %v1214_v40, %v1160_v33  ;;  %v1164_v5 = vpop.permute.xlu1 %1163 }
 0x737   : > { %v1161_v38 = vadd.f32 %v1159_v32, %v1155_v34  ;;  %v1170_v6 = vmul.f32 %v1164_v5, %v1160_v33 }
 0x738   : > { %1184 = vrot.lane.b32.xlu1 %v1180_v36, %s3612_s22  ;;  %1204 = vrot.lane.b32.xlu0 %v1200_v37, %s3624_s21  ;;  %v1288_v37 = vld [vmem:[%s3605_s11 + $0x10] sm:$0xff] }
 0x739   : > { %v1181_v39 = vmul.f32 %v1178_v31, %v1161_v38  ;;  %v1201_v44 = vmul.f32 %v1198_v42, %v1161_v38  ;;  %v1221_v46 = vmul.f32 %v1218_v45, %v1161_v38  ;;  %v1171_v14 = vmul.f32 %v1168_v59, %v1161_v38  ;;  %v1287_v38 = vld [vmem:[%s3605_s11 + $0x8] sm:$0xff] }
 0x73c   : > { %1186 = vrot.lane.b32.xlu1 %v1181_v39, %s3612_s22  ;;  %1224 = vrot.lane.b32.xlu0 %v1220_v41, %s3623_s24  ;;  %v1286_v39 = vld [vmem:[%s3605_s11] sm:$0xff] }
 0x740   : > { %1206 = vrot.lane.b32.xlu1 %v1201_v44, %s3624_s21  ;;  %v2796_v61 = vpop.eup %2795 }
 0x741   : > { %v1255_v16 = vmul.f32 %v2796_v61, %v3100_v50 }
 0x742   : > { %v2798_v22 = vpop.eup %2797 }
 0x743   : > { %v1256_v52 = vmul.f32 %v2798_v22, %v3098_v48  ;;  %v1289_v48 = vld [vmem:[%s3605_s11 + $0x18] sm:$0xff] }
 0x744   : > { %1226 = vrot.lane.b32.xlu1 %v1221_v46, %s3623_s24  ;;  %2602 = vmatprep.subr.mxu0 %v1289_v48 }
 0x745   : > { %2603 = vmatpush3.msra.mxu0 %v1289_v48  ;;  %v2440_v48 = vld [vmem:[%s3597_s3 + $0x98] sm:$0xff] }
 0x746   : > { %2604 = vmatprep.subr.mxu0 %v1288_v37 }
 0x747   : > { %2605 = vmatpush3.msra.mxu0 %v1288_v37  ;;  %v2439_v37 = vld [vmem:[%s3597_s3 + $0x90] sm:$0xff] }
 0x748   : > { %2606 = vmatprep.subr.mxu0 %v1287_v38 }
 0x749   : > { %2607 = vmatpush3.msra.mxu0 %v1287_v38  ;;  %v2438_v38 = vld [vmem:[%s3597_s3 + $0x88] sm:$0xff] }
 0x74a   : > { %2608 = vmatprep.subr.mxu0 %v1286_v39 }
 0x74b   : > { %2609 = vmatpush3.msra.mxu0 %v1286_v39  ;;  %v2437_v39 = vld [vmem:[%s3597_s3 + $0x80] sm:$0xff] }
 0x7aa   : > { %v1205_v7 = vpop.permute.xlu0 %1204  ;;  %v1185_v8 = vpop.permute.xlu1 %1184 }
 0x7ab   : > { %v1190_v9 = vadd.f32 %v1185_v8, %v1170_v6 }
 0x7ad   : > { %v1210_v11 = vadd.f32 %v1205_v7, %v1190_v9 }
 0x7ae   : > { %v1225_v12 = vpop.permute.xlu0 %1224  ;;  %v1187_v13 = vpop.permute.xlu1 %1186 }
 0x7af   : > { %v1230_v55 = vadd.f32 %v1225_v12, %v1210_v11  ;;  %v1191_v18 = vadd.f32 %v1187_v13, %v1171_v14 }
 0x7b1   : > { %v1241_v15 = vadd.f32 %v1239_v60, %v1230_v55 }
 0x7b2   : > { %v1207_v17 = vpop.permute.xlu1 %1206 }
 0x7b3   : > { %v1257_v19 = vmul.f32 %v1255_v16, %v1241_v15  ;;  %v1211_v20 = vadd.f32 %v1207_v17, %v1191_v18 }
 0x7b5   : > { %v1259_v21 = vsel %vm602_vm4, %v1257_v19, 0.0 }
 0x7b6   : > { %1260 = vadd.xlane.f32.xlu0 %v1259_v21  ;;  %v1227_v23 = vpop.permute.xlu1 %1226 }
 0x7b7   : > { %v1231_v25 = vadd.f32 %v1227_v23, %v1211_v20 }
 0x7b9   : > { %v1242_v26 = vadd.f32 %v1240_v24, %v1231_v25  ;;  %v2428_v25 = vld [vmem:[%s3622_s1 + $0x18] sm:$0xff] }
 0x7ba   : > { %2613 = vmatprep.subr.mxu0 %v2428_v25 }
 0x7bb   : > { %v1258_v27 = vmul.f32 %v1256_v52, %v1242_v26  ;;  %v2427_v52 = vld [vmem:[%s3622_s1 + $0x10] sm:$0xff] }
 0x7bd   : > { %v1262_v28 = vsel %vm602_vm4, %v1258_v27, 0.0 }
 0x7be   : > { %1263 = vadd.xlane.f32.xlu1 %v1262_v28 }
 0x83f   : > { %v1261_v50 = vpop.xlane.xlu0 %1260 }
 0x840   : > { %v1266_v29 = vmul.f32 0.03125, %v1261_v50 }
 0x842   : > { %v1268_v30 = vsub.f32 %v1257_v19, %v1266_v29 }
 0x844   : > { %v1270_v31 = vmul.f32 %v1268_v30, %v1268_v30 }
 0x846   : > { %v1272_v32 = vsel %vm602_vm4, %v1270_v31, 0.0 }
 0x847   : > { %1273 = vadd.xlane.f32.xlu0 %v1272_v32  ;;  %v1264_v33 = vpop.xlane.xlu1 %1263 }
 0x848   : > { %v1267_v34 = vmul.f32 0.03125, %v1264_v33 }
 0x84a   : > { %v1269_v35 = vsub.f32 %v1258_v27, %v1267_v34  ;;  %v2444_v34 = vld [vmem:[%s3597_s3 + $0xb8] sm:$0xff] }
 0x84b   : > { %2620 = vmatprep.subr.mxu1 %v2444_v34 }
 0x84c   : > { %v1271_v36 = vmul.f32 %v1269_v35, %v1269_v35  ;;  %2621 = vmatpush3.msra.mxu1 %v2444_v34 }
 0x84e   : > { %v1275_v53 = vsel %vm602_vm4, %v1271_v36, 0.0  ;;  %v2442_v36 = vld [vmem:[%s3597_s3 + $0xa8] sm:$0xff] }
 0x84f   : > { %1276 = vadd.xlane.f32.xlu0 %v1275_v53  ;;  %v2441_v53 = vld [vmem:[%s3597_s3 + $0xa0] sm:$0xff] }
 0x8d0   : > { %v1274_v40 = vpop.xlane.xlu0 %1273 }
 0x8d1   : > { %v1278_v41 = vmul.f32 0.03125, %v1274_v40  ;;  %v2436_v40 = vld [vmem:[%s3597_s3 + $0x78] sm:$0xff] }
 0x8d3   : > { %v1280_v42 = vadd.f32 1e-05, %v1278_v41  ;;  %v2435_v41 = vld [vmem:[%s3597_s3 + $0x70] sm:$0xff] }
 0x8d5   : > { %2799 = vrsqrt.f32 %v1280_v42  ;;  %v2434_v42 = vld [vmem:[%s3597_s3 + $0x68] sm:$0xff] }
 0x8d8   : > { %v1277_v44 = vpop.xlane.xlu0 %1276 }
 0x8d9   : > { %v1279_v45 = vmul.f32 0.03125, %v1277_v44  ;;  %v2433_v44 = vld [vmem:[%s3597_s3 + $0x60] sm:$0xff] }
 0x8db   : > { %v1281_v46 = vadd.f32 1e-05, %v1279_v45  ;;  %v2430_v45 = vld [vmem:[%s3596_s2 + $0x1] ss:$0 sm:$0xff] }
 0x8dd   : > { %2801 = vrsqrt.f32 %v1281_v46 }
 0x8e2   : > { %v2800_v47 = vpop.eup %2799 }
 0x8e3   : > { %v1284_v43 = vmul.f32 %v2800_v47, %v1268_v30 }
 0x8e5   : > { %2610 = vmatprep.mubr.msk.f32.mxu0 %vm602_vm4, %v1284_v43 }
 0x8ea   : > { %v2802_v51 = vpop.eup %2801 }
 0x8eb   : > { %v1285_v56 = vmul.f32 %v2802_v51, %v1269_v35  ;;  %v2443_v35 = vld [vmem:[%s3597_s3 + $0xb0] sm:$0xff] }
 0x8ec   : > { %2622 = vmatprep.subr.mxu1 %v2443_v35 }
 0x8ed   : > { %2611 = vmatmul.mubr.msk.f32.vlgmr.msra.gmra.mxu0 %vm602_vm4, %v1285_v56  ;;  %2623 = vmatpush3.msra.mxu1 %v2443_v35 }
 0x8ee   : > { %2614 = vmatpush3.msra.mxu0 %v2428_v25  ;;  %2624 = vmatprep.subr.mxu1 %v2442_v36 }
 0x8ef   : > { %2615 = vmatprep.subr.mxu0 %v2427_v52  ;;  %2625 = vmatpush3.msra.mxu1 %v2442_v36 }
 0x8f0   : > { %2616 = vmatpush3.msra.mxu0 %v2427_v52  ;;  %2626 = vmatprep.subr.mxu1 %v2441_v53 }
 0x8f1   : > { %2627 = vmatpush3.msra.mxu1 %v2441_v53 }
 0x8f2   : > { %2628 = vmatprep.subr.mxu1 %v2440_v48 }
 0x8f3   : > { %2629 = vmatpush3.msra.mxu1 %v2440_v48 }
 0x8f4   : > { %2630 = vmatprep.subr.mxu1 %v2439_v37 }
 0x8f5   : > { %2631 = vmatpush3.msra.mxu1 %v2439_v37 }
 0x8f6   : > { %2632 = vmatprep.subr.mxu1 %v2438_v38 }
 0x8f7   : > { %2633 = vmatpush3.msra.mxu1 %v2438_v38 }
 0x8f8   : > { %2634 = vmatprep.subr.mxu1 %v2437_v39 }
 0x8f9   : > { %2635 = vmatpush3.msra.mxu1 %v2437_v39 }
 0x8fa   : > { %2636 = vmatprep.subr.mxu1 %v2436_v40 }
 0x8fb   : > { %2637 = vmatpush3.msra.mxu1 %v2436_v40 }
 0x8fc   : > { %2638 = vmatprep.subr.mxu1 %v2435_v41 }
 0x8fd   : > { %2639 = vmatpush3.msra.mxu1 %v2435_v41 }
 0x8fe   : > { %2640 = vmatprep.subr.mxu1 %v2434_v42 }
 0x8ff   : > { %2641 = vmatpush3.msra.mxu1 %v2434_v42 }
 0x900   : > { %2642 = vmatprep.subr.mxu1 %v2433_v44 }
 0x901   : > { %2643 = vmatpush3.msra.mxu1 %v2433_v44 }
 0x9ad   : > { %v2612_v58 = vpop.f32.mrf.mxu0 }
 0x9ae   : > { %v1375_v59 = vadd.f32 %v2612_v58, %v2424_v57 }
 0x9af   : > { %v1369_v5 = vpop.f32.mrf.mxu0 }
 0x9b0   : > { %v3291_v6 = vadd.f32 %v1375_v59, %v3041_v1  ;;  %v1370_v7 = vadd.f32 %v2424_v57, %v1369_v5 }
 0x9b2   : > { %v3294_v8 = vadd.f32 %v1370_v7, %v3039_v0  ;;  %v1381_v10 = vsel %vm441_vm0, %v3291_v6, 0.0 }
 0x9b4   : > { %v1380_v9 = vsel %vm441_vm0, %v3294_v8, 0.0 }
 0x9b5   : > { %v1382_v11 = vadd.f32 %v1381_v10, %v1380_v9 }
 0x9b7   : > { %1383 = vadd.xlane.f32.xlu1 %v1382_v11 }
 0xa40   : > { %v1384_v61 = vpop.xlane.xlu1 %1383 }
 0xa41   : > { %v1385_v12 = vrot.slane %v1384_v61, 4 }
 0xa43   : > { %v1386_v13 = vadd.f32 %v1385_v12, %v1384_v61 }
 0xa45   : > { %v1387_v60 = vrot.slane %v1386_v13, 2 }
 0xa47   : > { %v1388_v55 = vadd.f32 %v1387_v60, %v1386_v13 }
 0xa49   : > { %v1389_v14 = vrot.slane %v1388_v55, 1 }
 0xa4b   : > { %v1390_v1 = vadd.f32 %v1389_v14, %v1388_v55 }
 0xa4d   : > { %2680 = vpush %v1390_v1 }
 0xa7e   : > { %s2681_s16 = spop %2680 }
 0xa7f   : > { %s1394_s22 = smul.f32 0.00390625, %s2681_s16 }
 0xa81   : > { %v1395_v0 = vstv %s1394_s22 }
 0xa82   : > { %v1396_v15 = vsub.f32 %v3294_v8, %v1395_v0  ;;  %v1397_v16 = vsub.f32 %v3291_v6, %v1395_v0  ;;  %v2454_v0 = vld [vmem:[%s3601_s7 + $0x38] sm:$0xff] }
 0xa83   : > { %2647 = vmatprep.subr.mxu0 %v2454_v0 }
 0xa84   : > { %v1398_v17 = vmul.f32 %v1396_v15, %v1396_v15  ;;  %v1399_v18 = vmul.f32 %v1397_v16, %v1397_v16 }
 0xa86   : > { %v1400_v19 = vsel %vm441_vm0, %v1398_v17, 0.0  ;;  %v1401_v20 = vsel %vm441_vm0, %v1399_v18, 0.0  ;;  %v2451_v17 = vld [vmem:[%s3601_s7 + $0x20] sm:$0xff] }
 0xa87   : > { %v1402_v21 = vadd.f32 %v1401_v20, %v1400_v19  ;;  %v2446_v18 = vld [vmem:[%s3598_s4 + $0x1] ss:$0 sm:$0xff] }
 0xa89   : > { %1403 = vadd.xlane.f32.xlu0 %v1402_v21 }
 0xb12   : > { %v1404_v22 = vpop.xlane.xlu0 %1403 }
 0xb13   : > { %v1405_v23 = vrot.slane %v1404_v22, 4 }
 0xb15   : > { %v1406_v24 = vadd.f32 %v1405_v23, %v1404_v22 }
 0xb17   : > { %v1407_v26 = vrot.slane %v1406_v24, 2 }
 0xb19   : > { %v1408_v27 = vadd.f32 %v1407_v26, %v1406_v24 }
 0xb1b   : > { %v1409_v28 = vrot.slane %v1408_v27, 1 }
 0xb1d   : > { %v1410_v50 = vadd.f32 %v1409_v28, %v1408_v27 }
 0xb1f   : > { %2682 = vpush %v1410_v50 }
 0xb50   : > { %s2683_s0 = spop %2682 }
 0xb51   : > { %s1414_s17 = smul.f32 0.00390625, %s2683_s0 }
 0xb53   : > { %s1415_s16 = sadd.f32 1e-05, %s1414_s17  ;;  %s3625_s17 = smov 120  }
 0xb55   : > { %v1416_v29 = vstv %s1415_s16 }
 0xb56   : > { %2803 = vrsqrt.f32 %v1416_v29 }
 0xb63   : > { %v2804_v30 = vpop.eup %2803 }
 0xb64   : > { %2684 = vpush %v2804_v30 }
 0xb95   : > { %s2685_s22 = spop %2684 }
 0xb96   : > { %v1419_v31 = vstv %s2685_s22 }
 0xb97   : > { %v1420_v32 = vmul.f32 %v1419_v31, %v1396_v15  ;;  %v1421_v33 = vmul.f32 %v1419_v31, %v1397_v16  ;;  %v2453_v15 = vld [vmem:[%s3601_s7 + $0x30] sm:$0xff]  ;;  %v2452_v16 = vld [vmem:[%s3601_s7 + $0x28] sm:$0xff] }
 0xb99   : > { %2617 = vmatprep.mubr.msk.f32.mxu0 %vm441_vm0, %v1420_v32 }
 0xb9a   : > { %2618 = vmatmul.mubr.msk.f32.vlgmr.msra.gmra.mxu0 %vm441_vm0, %v1421_v33 }
 0xb9b   : > { %2648 = vmatpush3.msra.mxu0 %v2454_v0 }
 0xb9c   : > { %2649 = vmatprep.subr.mxu0 %v2453_v15 }
 0xb9d   : > { %2650 = vmatpush3.msra.mxu0 %v2453_v15 }
 0xb9e   : > { %2651 = vmatprep.subr.mxu0 %v2452_v16 }
 0xb9f   : > { %2652 = vmatpush3.msra.mxu0 %v2452_v16 }
 0xba0   : > { %2653 = vmatprep.subr.mxu0 %v2451_v17 }
 0xba1   : > { %2654 = vmatpush3.msra.mxu0 %v2451_v17 }
 0xc5a   : > { %v2619_v46 = vpop.f32.mrf.mxu0 }
 0xc5b   : > { %v3351_v47 = vadd.f32 %v2619_v46, %v2430_v45 }
 0xc5c   : > { %v1505_v43 = vpop.f32.mrf.mxu0 }
 0xc5d   : > { %v3353_v51 = vadd.f32 %v2430_v45, %v1505_v43  ;;  %1529 = vrot.lane.b32.xlu0 %v3351_v47, %s3623_s24  ;;  %v1523_v57 = vrot.slane %v3351_v47, 1  ;;  %v1517_v59 = vrot.slane %v3351_v47, 7 }
 0xc5f   : > { %1527 = vrot.lane.b32.xlu1 %v3353_v51, %s3623_s24  ;;  %v1522_v56 = vrot.slane %v3353_v51, 1  ;;  %v1516_v58 = vrot.slane %v3353_v51, 7  ;;  %v1526_v9 = vsel %vm583_vm2, %v1523_v57, 0.0 }
 0xc61   : > { %v1524_v5 = vsel %vm583_vm2, %v1522_v56, %v1523_v57  ;;  %v1518_v7 = vsel %vm576_vm1, %v1516_v58, %v1517_v59  ;;  %v1521_v11 = vsel %vm576_vm1, 0.0, %v1516_v58 }
 0xc63   : > { %1534 = vrot.lane.b32.xlu1 %v1524_v5, %s3624_s21 }
 0xc67   : > { %1536 = vrot.lane.b32.xlu1 %v1526_v9, %s3624_s21 }
 0xccf   : > { %v1530_v13 = vpop.permute.xlu0 %1529 }
 0xcd0   : > { %v1541_v55 = vsel %vm602_vm4, %v1518_v7, %v1530_v13  ;;  %v2456_v13 = vld [vmem:[%s3602_s8 + $0x1] ss:$0 sm:$0xff] }
 0xcd1   : > { %v1528_v10 = vpop.permute.xlu1 %1527 }
 0xcd2   : > { %v1540_v61 = vsel %vm602_vm4, %v1521_v11, %v1528_v10 }
 0xcd5   : > { %v1535_v12 = vpop.permute.xlu1 %1534 }
 0xcd6   : > { %v1542_v60 = vsel %vm605_vm3, %v1540_v61, %v1535_v12  ;;  %v2459_v12 = vld [vmem:[%s3603_s9 + $0x1] sm:$0x1] }
 0xcd7   : > { %2644 = vmatprep.mubr.msk.f32.mxu1 %vm627_vm5, %v1542_v60  ;;  %2658 = vmatprep.subr.msk.mxu0 %vm576_vm1, %v2459_v12 }
 0xcd9   : > { %v1537_v14 = vpop.permute.xlu1 %1536 }
 0xcda   : > { %v1543_v1 = vsel %vm605_vm3, %v1541_v55, %v1537_v14 }
 0xcdb   : > { %2645 = vmatmul.mubr.msk.f32.vlgmr.msra.gmra.mxu1 %vm627_vm5, %v1543_v1 }
 0xd9b   : > { %v2646_v19 = vpop.f32.mrf.mxu1 }
 0xd9c   : > { %v1643_v20 = vadd.f32 %v2646_v19, %v2446_v18 }
 0xd9d   : > { %v1637_v21 = vpop.f32.mrf.mxu1 }
 0xd9e   : > { %v1638_v22 = vadd.f32 %v2446_v18, %v1637_v21  ;;  %v1647_v23 = vsel %vm602_vm4, %v1643_v20, 0.0 }
 0xda0   : > { %v1646_v24 = vsel %vm602_vm4, %v1638_v22, 0.0 }
 0xda1   : > { %v1648_v25 = vadd.f32 %v1647_v23, %v1646_v24 }
 0xda3   : > { %v1649_v26 = vrot.slane %v1648_v25, 4 }
 0xda5   : > { %v1650_v52 = vadd.f32 %v1649_v26, %v1648_v25 }
 0xda7   : > { %v1651_v27 = vrot.slane %v1650_v52, 2 }
 0xda9   : > { %v1652_v28 = vadd.f32 %v1651_v27, %v1650_v52 }
 0xdab   : > { %v1653_v50 = vrot.slane %v1652_v28, 1 }
 0xdad   : > { %v1654_v29 = vadd.f32 %v1653_v50, %v1652_v28 }
 0xdaf   : > { %v1655_v30 = vmul.f32 0.0625, %v1654_v29 }
 0xdb1   : > { %v1656_v31 = vsub.f32 %v1638_v22, %v1655_v30  ;;  %v1657_v32 = vsub.f32 %v1643_v20, %v1655_v30 }
 0xdb3   : > { %v1658_v33 = vmul.f32 %v1656_v31, %v1656_v31  ;;  %v1659_v34 = vmul.f32 %v1657_v32, %v1657_v32 }
 0xdb5   : > { %v1660_v35 = vsel %vm602_vm4, %v1658_v33, 0.0  ;;  %v1661_v36 = vsel %vm602_vm4, %v1659_v34, 0.0 }
 0xdb6   : > { %v1662_v53 = vadd.f32 %v1661_v36, %v1660_v35 }
 0xdb8   : > { %v1663_v48 = vrot.slane %v1662_v53, 4 }
 0xdba   : > { %v1664_v37 = vadd.f32 %v1663_v48, %v1662_v53 }
 0xdbc   : > { %v1665_v38 = vrot.slane %v1664_v37, 2 }
 0xdbe   : > { %v1666_v39 = vadd.f32 %v1665_v38, %v1664_v37 }
 0xdc0   : > { %v1667_v40 = vrot.slane %v1666_v39, 1 }
 0xdc2   : > { %v1668_v41 = vadd.f32 %v1667_v40, %v1666_v39 }
 0xdc4   : > { %v1669_v42 = vmul.f32 0.0625, %v1668_v41 }
 0xdc6   : > { %v1670_v44 = vadd.f32 1e-05, %v1669_v42 }
 0xdc8   : > { %2805 = vrsqrt.f32 %v1670_v44 }
 0xdd5   : > { %v2806_v45 = vpop.eup %2805 }
 0xdd6   : > { %v1672_v46 = vmul.f32 %v2806_v45, %v1656_v31  ;;  %v1673_v43 = vmul.f32 %v2806_v45, %v1657_v32 }
 0xdd8   : > { %v2449_v56 = vmul.f32 -1.442695, %v1672_v46  ;;  %v2450_v57 = vmul.f32 -1.442695, %v1673_v43 }
 0xdda   : > { %2807 = vpow2.f32 %v2449_v56 }
 0xddb   : > { %2809 = vpow2.f32 %v2450_v57 }
 0xde7   : > { %v2808_v58 = vpop.eup %2807 }
 0xde8   : > { %v2810_v59 = vpop.eup %2809  ;;  %v1680_v5 = vadd.f32 1.0, %v2808_v58 }
 0xde9   : > { %v1681_v7 = vadd.f32 1.0, %v2810_v59 }
 0xdea   : > { %2811 = vrcp.f32 %v1680_v5 }
 0xdeb   : > { %2813 = vrcp.f32 %v1681_v7 }
 0xdf7   : > { %v2812_v9 = vpop.eup %2811 }
 0xdf8   : > { %v2814_v10 = vpop.eup %2813  ;;  %v3394_v11 = vmul.f32 %v2812_v9, %v1672_v46 }
 0xdf9   : > { %v3396_v61 = vmul.f32 %v2814_v10, %v1673_v43 }
 0xdfa   : > { %2655 = vmatprep.mubr.msk.f32.mxu0 %vm602_vm4, %v3394_v11 }
 0xdfb   : > { %2656 = vmatmul.mubr.msk.f32.vlgmr.msra.gmra.mxu0 %vm602_vm4, %v3396_v61 }
 0xdfc   : > { %2659 = vmatpush3.msk.msra.mxu0 %vm576_vm1, %v2459_v12 }
 0xebb   : > { %v2657_v60 = vpop.f32.mrf.mxu0 }
 0xebc   : > { %v3410_v55 = vadd.f32 %v2657_v60, %v2456_v13 }
 0xebd   : > { %v1773_v14 = vpop.f32.mrf.mxu0 }
 0xebe   : > { %v3412_v1 = vadd.f32 %v2456_v13, %v1773_v14  ;;  %1796 = vrot.lane.b32.xlu1 %v3410_v55, %s3625_s17 }
 0xec0   : > { %1794 = vrot.lane.b32.xlu0 %v3412_v1, %s3625_s17  ;;  %s2485_s17 = sshll.u32 %s3007_s29, 8  ;;  %s3554_s29 = scalar_lea.sflag [#allocation3], %s431_s15 }
 0xec2   : > { %1975 = vperm.xlu1 %2752, %v3410_v55  }
 0xec4   : > { %1971 = vperm.xlu0 %2753, %v3412_v1  }
 0xec6   : > { %2754 = vset.pattern.permute.xlu1 %v2906_v62  ;;  %v2461_v62 = vld [vmem:[%s3604_s10 + $0x1] ss:$0 sm:$0xff] }
 0xec7   : > { %1981 = vperm.xlu1 %2754, %v3412_v1  }
 0xec8   : > { %2755 = vset.pattern.permute.xlu0 %v2903_v54 }
 0xec9   : > { %1991 = vperm.xlu0 %2755, %v3412_v1  }
 0xecb   : > { %1985 = vperm.xlu1 %2754, %v3410_v55  }
 0xecd   : > { %2757 = vset.pattern.permute.xlu0 %v2907_v3 }
 0xecf   : > { %2756 = vset.pattern.permute.xlu1 %v2903_v54 }
 0xed0   : > { %1995 = vperm.xlu1 %2756, %v3410_v55  }
 0xed4   : > { %2758 = vset.pattern.permute.xlu1 %v2907_v3 }
 0xf30   : > { %v1797_v15 = vpop.permute.xlu1 %1796 }
 0xf32   : > { %v1795_v0 = vpop.permute.xlu0 %1794 }
 0xf33   : > { %2660 = vmatprep.mubr.msk.f32.mxu0 %vm858_vm6, %v1795_v0 }
 0xf34   : > { %2661 = vmatmul.mubr.msk.f32.vlgmr.msra.gmra.mxu0 %vm858_vm6, %v1797_v15 }
 0xf3d   : > { %v1976_v45 = vpop.permute.xlu1 %1975 }
 0xf3f   : > { %v1972_v56 = vpop.permute.xlu0 %1971 }
 0xf42   : > { %v1982_v46 = vpop.permute.xlu1 %1981 }
 0xf44   : > { %v1992_v7 = vpop.permute.xlu0 %1991 }
 0xf46   : > { %v1986_v59 = vpop.permute.xlu1 %1985 }
 0xf4b   : > { %v1996_v12 = vpop.permute.xlu1 %1995 }
 0xff4   : > { %v2662_v16 = vpop.f32.mrf.mxu0 }
 0xff5   : > { %v1877_v17 = vadd.f32 %v2662_v16, %v2461_v62  ;;  %v2466_v16 = vld [vmem:[%s3599_s5 + $0x1] ss:$0 sm:$0xff] }
 0xff6   : > { %v1871_v18 = vpop.f32.mrf.mxu0 }
 0xff7   : > { %v1887_v19 = vand.u32 2147483647, %v1877_v17  ;;  %v1872_v20 = vadd.f32 %v2461_v62, %v1871_v18  ;;  %v1881_v36 = vmax.f32 %v1877_v17, 0.0  ;;  %vm1883_vm15 = vcmp.ne.f32.partialorder %v1877_v17, %v1877_v17 }
 0xff9   : > { %v1889_v54 = vsub.f32 0.0, %v1887_v19  ;;  %v1886_v21 = vand.u32 2147483647, %v1872_v20  ;;  %v1880_v38 = vmax.f32 %v1872_v20, 0.0  ;;  %vm1882_vm2 = vcmp.ne.f32.partialorder %v1872_v20, %v1872_v20 }
 0xffb   : > { %v1892_v22 = vmul.f32 1.442695, %v1889_v54  ;;  %v1888_v23 = vsub.f32 0.0, %v1886_v21 }
 0xffd   : > { %2815 = vpow2.f32 %v1892_v22  ;;  %v1890_v3 = vmul.f32 1.442695, %v1888_v23 }
 0xfff   : > { %2817 = vpow2.f32 %v1890_v3 }
0x100a   : > { %v2816_v24 = vpop.eup %2815 }
0x100b   : > { %v1903_v25 = vadd.f32 1.0, %v2816_v24  ;;  %v1906_v27 = vmul.f32 -0.5, %v2816_v24  ;;  %v1909_v29 = vand.u32 2147483647, %v2816_v24 }
0x100c   : > { %v2818_v26 = vpop.eup %2817 }
0x100d   : > { %2819 = vlog2.f32 %v1903_v25  ;;  %v1894_v52 = vadd.f32 1.0, %v2818_v26  ;;  %v1897_v28 = vmul.f32 -0.5, %v2818_v26  ;;  %v1907_v50 = vadd.f32 1.0, %v1906_v27 }
0x100e   : > { %v1900_v32 = vand.u32 2147483647, %v2818_v26  ;;  %vm1910_vm13 = vcmp.lt.f32.partialorder %v1909_v29, 0.0004427343 }
0x100f   : > { %2821 = vlog2.f32 %v1894_v52  ;;  %v1898_v30 = vadd.f32 1.0, %v1897_v28  ;;  %v1908_v34 = vmul.f32 %v2816_v24, %v1907_v50 }
0x1010   : > { %vm1901_vm14 = vcmp.lt.f32.partialorder %v1900_v32, 0.0004427343 }
0x1011   : > { %v1899_v37 = vmul.f32 %v2818_v26, %v1898_v30 }
0x101a   : > { %v2820_v31 = vpop.eup %2819 }
0x101b   : > { %v1905_v33 = vmul.f32 0.6931472, %v2820_v31 }
0x101c   : > { %v2822_v35 = vpop.eup %2821 }
0x101d   : > { %v1911_v53 = vsel %vm1910_vm13, %v1908_v34, %v1905_v33  ;;  %v1896_v48 = vmul.f32 0.6931472, %v2822_v35 }
0x101e   : > { %v1913_v39 = vadd.f32 %v1911_v53, %v1881_v36 }
0x101f   : > { %v1902_v40 = vsel %vm1901_vm14, %v1899_v37, %v1896_v48 }
0x1020   : > { %v1915_v41 = vsel %vm1883_vm15, %v1877_v17, %v1913_v39  ;;  %v1912_v42 = vadd.f32 %v1902_v40, %v1880_v38 }
0x1021   : > { %1920 = vrot.lane.b32.xlu0 %v1915_v41, %s3623_s24  ;;  %v3445_v57 = vmul.f32 %v1915_v41, %v3396_v61 }
0x1022   : > { %v1914_v44 = vsel %vm1882_vm2, %v1872_v20, %v1912_v42 }
0x1023   : > { %1924 = vrot.lane.b32.xlu1 %v1914_v44, %s3624_s21  ;;  %v3441_v43 = vmul.f32 %v1914_v44, %v3394_v11  ;;  %v1979_v5 = vmul.f32 %v1976_v45, %v3445_v57  ;;  %v1999_v13 = vmul.f32 %v1996_v12, %v3445_v57  ;;  %v1989_v60 = vmul.f32 %v1986_v59, %v3445_v57 }
0x1025   : > { %1918 = vrot.lane.b32.xlu0 %v1914_v44, %s3623_s24  ;;  %v1988_v58 = vmul.f32 %v1982_v46, %v3441_v43  ;;  %v1998_v9 = vmul.f32 %v1992_v7, %v3441_v43  ;;  %v1978_v10 = vmul.f32 %v1972_v56, %v3441_v43 }
0x1027   : > { %1930 = vrot.lane.b32.xlu1 %v1914_v44, %s3626_s30 }
0x1029   : > { %1926 = vrot.lane.b32.xlu0 %v1915_v41, %s3624_s21 }
0x102b   : > { %1932 = vrot.lane.b32.xlu1 %v1915_v41, %s3626_s30 }
0x102d   : > { %1961 = vperm.xlu0 %2757, %v3412_v1  }
0x102f   : > { %1965 = vperm.xlu1 %2758, %v3410_v55  }
0x1031   : > { %2010 = vrot.lane.b32.xlu0 %v1988_v58, %s3624_s21 }
0x1032   : > { %2760 = vset.pattern.permute.xlu0 %v2909_v49 }
0x1033   : > { %2004 = vrot.lane.b32.xlu1 %v1979_v5, %s3623_s24 }
0x1034   : > { %2759 = vset.pattern.permute.xlu1 %v2909_v49 }
0x1035   : > { %2018 = vrot.lane.b32.xlu0 %v1998_v9, %s3626_s30 }
0x1037   : > { %2002 = vrot.lane.b32.xlu1 %v1978_v10, %s3623_s24 }
0x1039   : > { %2020 = vrot.lane.b32.xlu0 %v1999_v13, %s3626_s30 }
0x103b   : > { %2012 = vrot.lane.b32.xlu1 %v1989_v60, %s3624_s21 }
0x103d   : > { %2115 = vperm.xlu0 %2760, %v3410_v55  }
0x103f   : > { %2111 = vperm.xlu1 %2759, %v3412_v1  }
0x1041   : > { %2762 = vset.pattern.permute.xlu0 %v2910_v63 }
0x1042   : > { %2151 = vperm.xlu0 %2762, %v3412_v1  }
0x1043   : > { %2761 = vset.pattern.permute.xlu1 %v2911_v2 }
0x1044   : > { %2131 = vperm.xlu1 %2761, %v3412_v1  }
0x1046   : > { %2765 = vset.pattern.permute.xlu0 %v2912_v4 }
0x1047   : > { %2105 = vperm.xlu0 %2765, %v3410_v55  }
0x1048   : > { %2135 = vperm.xlu1 %2761, %v3410_v55  }
0x104b   : > { %2766 = vset.pattern.permute.xlu0 %v2910_v63 }
0x104c   : > { %2763 = vset.pattern.permute.xlu1 %v2910_v63 }
0x104d   : > { %2155 = vperm.xlu1 %2763, %v3410_v55  }
0x1051   : > { %2764 = vset.pattern.permute.xlu1 %v2912_v4 }
0x1052   : > { %2101 = vperm.xlu1 %2764, %v3412_v1  }
0x1093   : > { %v1921_v49 = vpop.permute.xlu0 %1920 }
0x1094   : > { %v1937_v55 = vsel %vm602_vm4, %v1915_v41, %v1921_v49 }
0x1095   : > { %v1925_v2 = vpop.permute.xlu1 %1924 }
0x1097   : > { %v1919_v14 = vpop.permute.xlu0 %1918 }
0x1098   : > { %v1936_v0 = vsel %vm602_vm4, %v1914_v44, %v1919_v14 }
0x1099   : > { %v1931_v15 = vpop.permute.xlu1 %1930  ;;  %v1938_v62 = vsel %vm605_vm3, %v1936_v0, %v1925_v2 }
0x109a   : > { %v1940_v63 = vsel %vm627_vm5, %v1938_v62, %v1931_v15 }
0x109b   : > { %v1942_v17 = vsub.f32 0.0, %v1940_v63  ;;  %v1927_v4 = vpop.permute.xlu0 %1926 }
0x109c   : > { %v1939_v1 = vsel %vm605_vm3, %v1937_v55, %v1927_v4 }
0x109d   : > { %v1952_v18 = vmul.f32 %v2466_v16, %v1942_v17  ;;  %v1933_v19 = vpop.permute.xlu1 %1932 }
0x109e   : > { %v1941_v20 = vsel %vm627_vm5, %v1939_v1, %v1933_v19 }
0x109f   : > { %v1954_v54 = vmul.f32 1.442695, %v1952_v18  ;;  %v1943_v21 = vsub.f32 0.0, %v1941_v20 }
0x10a1   : > { %2823 = vpow2.f32 %v1954_v54  ;;  %v1953_v22 = vmul.f32 %v2466_v16, %v1943_v21 }
0x10a3   : > { %v1956_v23 = vmul.f32 1.442695, %v1953_v22 }
0x10a5   : > { %2825 = vpow2.f32 %v1956_v23 }
0x10a8   : > { %v1962_v3 = vpop.permute.xlu0 %1961 }
0x10a9   : > { %v1968_v28 = vmul.f32 %v1962_v3, %v3441_v43 }
0x10aa   : > { %v1966_v24 = vpop.permute.xlu1 %1965 }
0x10ab   : > { %v1969_v35 = vmul.f32 %v1966_v24, %v3445_v57 }
0x10ac   : > { %v2011_v25 = vpop.permute.xlu0 %2010 }
0x10ae   : > { %v2824_v26 = vpop.eup %2823  ;;  %v2005_v52 = vpop.permute.xlu1 %2004 }
0x10af   : > { %v2032_v27 = vrot.slane %v2824_v26, 7  ;;  %v2025_v38 = vsel %vm602_vm4, %v1969_v35, %v2005_v52 }
0x10b0   : > { %v2019_v50 = vpop.permute.xlu0 %2018 }
0x10b1   : > { %v2037_v29 = vsel %vm576_vm1, 1.0, %v2032_v27 }
0x10b2   : > { %v2826_v30 = vpop.eup %2825  ;;  %v2003_v31 = vpop.permute.xlu1 %2002  ;;  %v2050_v32 = vmul.f32 %v2824_v26, %v2037_v29 }
0x10b3   : > { %v2024_v33 = vsel %vm602_vm4, %v1968_v28, %v2003_v31  ;;  %v2033_v34 = vrot.slane %v2826_v30, 7 }
0x10b4   : > { %v2026_v36 = vsel %vm605_vm3, %v2024_v33, %v2011_v25  ;;  %v2054_v53 = vrot.slane %v2050_v32, 6  ;;  %v2021_v44 = vpop.permute.xlu0 %2020 }
0x10b5   : > { %v2028_v48 = vsel %vm627_vm5, %v2026_v36, %v2019_v50  ;;  %v2034_v37 = vsel %vm576_vm1, %v2032_v27, %v2033_v34 }
0x10b6   : > { %v2040_v39 = vrot.slane %v2028_v48, 7  ;;  %v2013_v40 = vpop.permute.xlu1 %2012  ;;  %v2051_v41 = vmul.f32 %v2826_v30, %v2034_v37  ;;  %v2059_v42 = vsel %vm1114_vm11, 1.0, %v2054_v53  ;;  %v2469_v37 = vmul.f32 -1.442695, %v3353_v51 }
0x10b7   : > { %v2027_v45 = vsel %vm605_vm3, %v2025_v38, %v2013_v40  ;;  %v2072_v59 = vmul.f32 %v2059_v42, %v2050_v32  ;;  %v2470_v38 = vmul.f32 -1.442695, %v3351_v47 }
0x10b8   : > { %v2045_v46 = vsel %vm576_vm1, 0.0, %v2040_v39  ;;  %v2029_v43 = vsel %vm627_vm5, %v2027_v45, %v2021_v44  ;;  %v2055_v56 = vrot.slane %v2051_v41, 6  ;;  %2827 = vpow2.f32 %v2469_v37 }
0x10b9   : > { %v2046_v57 = vmul.f32 %v2824_v26, %v2045_v46  ;;  %v2041_v58 = vrot.slane %v2029_v43, 7  ;;  %v2076_v49 = vrot.slane %v2072_v59, 4  ;;  %v2116_v26 = vpop.permute.xlu0 %2115  ;;  %2829 = vpow2.f32 %v2470_v38 }
0x10ba   : > { %v2056_v9 = vsel %vm1114_vm11, %v2054_v53, %v2055_v56  ;;  %v2112_v20 = vpop.permute.xlu1 %2111 }
0x10bb   : > { %v2048_v5 = vadd.f32 %v2046_v57, %v2028_v48  ;;  %v2042_v7 = vsel %vm576_vm1, %v2040_v39, %v2041_v58  ;;  %v2073_v60 = vmul.f32 %v2056_v9, %v2051_v41  ;;  %v2081_v63 = vsel %vm1137_vm12, 1.0, %v2076_v49  ;;  %v2468_v58 = vld [vmem:[%s3600_s6 + $0x1] ss:$0 sm:$0xff] }
0x10bc   : > { %v2047_v10 = vmul.f32 %v2826_v30, %v2042_v7  ;;  %v2094_v1 = vmul.f32 %v2081_v63, %v2072_v59 }
0x10bd   : > { %v2062_v12 = vrot.slane %v2048_v5, 6  ;;  %v2077_v16 = vrot.slane %v2073_v60, 4  ;;  %v2152_v33 = vpop.permute.xlu0 %2151 }
0x10be   : > { %v2049_v13 = vadd.f32 %v2047_v10, %v2029_v43  ;;  %v2096_v24 = vmul.f32 0.0, %v2094_v1  ;;  %v2178_v10 = vmul.f32 %v2468_v58, %v3394_v11 }
0x10bf   : > { %v2067_v2 = vsel %vm1114_vm11, 0.0, %v2062_v12  ;;  %v2078_v19 = vsel %vm1137_vm12, %v2076_v49, %v2077_v16  ;;  %v2132_v50 = vpop.permute.xlu1 %2131 }
0x10c0   : > { %v2068_v14 = vmul.f32 %v2067_v2, %v2050_v32  ;;  %v2063_v0 = vrot.slane %v2049_v13, 6  ;;  %v2095_v3 = vmul.f32 %v2078_v19, %v2073_v60 }
0x10c2   : > { %v2070_v15 = vadd.f32 %v2068_v14, %v2048_v5  ;;  %v2064_v62 = vsel %vm1114_vm11, %v2062_v12, %v2063_v0  ;;  %v2106_v44 = vpop.permute.xlu0 %2105 }
0x10c3   : > { %v2069_v55 = vmul.f32 %v2064_v62, %v2051_v41  ;;  %v2136_v35 = vpop.permute.xlu1 %2135 }
0x10c4   : > { %v2084_v17 = vrot.slane %v2070_v15, 4 }
0x10c5   : > { %v2071_v4 = vadd.f32 %v2069_v55, %v2049_v13  ;;  %v2828_v39 = vpop.eup %2827  ;;  %v2179_v55 = vmul.f32 %v2468_v58, %v3396_v61 }
0x10c6   : > { %v2089_v18 = vsel %vm1137_vm12, 0.0, %v2084_v17  ;;  %v2188_v40 = vadd.f32 1.0, %v2828_v39  ;;  %v2830_v41 = vpop.eup %2829 }
0x10c7   : > { %v2090_v54 = vmul.f32 %v2089_v18, %v2072_v59  ;;  %v2085_v21 = vrot.slane %v2071_v4, 4  ;;  %v2189_v42 = vadd.f32 1.0, %v2830_v41 }
0x10c8   : > { %v2156_v53 = vpop.permute.xlu1 %2155  ;;  %2831 = vrcp.f32 %v2188_v40 }
0x10c9   : > { %v2092_v22 = vadd.f32 %v2090_v54, %v2070_v15  ;;  %v2086_v23 = vsel %vm1137_vm12, %v2084_v17, %v2085_v21  ;;  %2833 = vrcp.f32 %v2189_v42 }
0x10ca   : > { %v2091_v25 = vmul.f32 %v2086_v23, %v2073_v60 }
0x10cb   : > { %v2097_v52 = vmul.f32 %v2095_v3, %v2092_v22  ;;  %v2098_v27 = vadd.f32 %v2096_v24, %v2092_v22 }
0x10cc   : > { %v2093_v28 = vadd.f32 %v2091_v25, %v2071_v4  ;;  %v2473_v25 = vld [vmem:[%s3605_s11 + $0x30] sm:$0xff] }
0x10cd   : > { %v2118_v29 = vmul.f32 %v2112_v20, %v2098_v27  ;;  %v2138_v30 = vmul.f32 %v2132_v50, %v2098_v27  ;;  %v2158_v34 = vmul.f32 %v2152_v33, %v2098_v27  ;;  %v2102_v45 = vpop.permute.xlu1 %2101 }
0x10ce   : > { %v2099_v31 = vadd.f32 %v2097_v52, %v2093_v28  ;;  %v2108_v46 = vmul.f32 %v2102_v45, %v2098_v27  ;;  %v2471_v52 = vld [vmem:[%s3605_s11 + $0x20] sm:$0xff] }
0x10cf   : > { %2142 = vrot.lane.b32.xlu0 %v2138_v30, %s3624_s21  ;;  %2122 = vrot.lane.b32.xlu1 %v2118_v29, %s3626_s30 }
0x10d0   : > { %v2119_v32 = vmul.f32 %v2116_v26, %v2099_v31  ;;  %v2139_v36 = vmul.f32 %v2136_v35, %v2099_v31  ;;  %v2159_v48 = vmul.f32 %v2156_v53, %v2099_v31  ;;  %v2109_v13 = vmul.f32 %v2106_v44, %v2099_v31  ;;  %v2472_v26 = vld [vmem:[%s3605_s11 + $0x28] sm:$0xff] }
0x10d3   : > { %2124 = vrot.lane.b32.xlu1 %v2119_v32, %s3626_s30  ;;  %2162 = vrot.lane.b32.xlu0 %v2158_v34, %s3623_s24  ;;  %s3547_s30 = scalar_lea.hbm %s3607_s13, %s2485_s17 }
0x10d5   : > { %v2832_v5 = vpop.eup %2831 }
0x10d6   : > { %v2194_v49 = vmul.f32 %v2832_v5, %v3353_v51  ;;  %v2834_v16 = vpop.eup %2833 }
0x10d7   : > { %2144 = vrot.lane.b32.xlu1 %v2139_v36, %s3624_s21  ;;  %v2195_v11 = vmul.f32 %v2834_v16, %v3351_v47  ;;  %v2474_v47 = vld [vmem:[%s3605_s11 + $0x38] sm:$0xff]  ;;  %s2402_s21 = sshll.u32 %s431_s15, 4  ;;  %v2476_v36 = vld [vmem:[%s3606_s12 + $0x1] ss:$0 sm:$0xff] }
0x10d8   : > { %2663 = vmatprep.subr.mxu0 %v2474_v47  ;;  %s433_s23 = scalar_lea.vmem [#allocation2], %s2402_s21  ;;  %s2913_s21 = smov [#allocation2]  }
0x10d9   : > { %2664 = vmatpush3.msra.mxu0 %v2474_v47  ;;  %s2336_s0 = sshll.u32 %s433_s23, 4  ;;  %s3549_s0 = int_to_ptr.vmem [resolvable:$true] %s2336_s0 }
0x10da   : > { %2665 = vmatprep.subr.mxu0 %v2473_v25  ;;  %s2839_s1 = scalar_lea.vmem %s3549_s0, 256 }
0x10db   : > { %2164 = vrot.lane.b32.xlu1 %v2159_v48, %s3623_s24  ;;  %2666 = vmatpush3.msra.mxu0 %v2473_v25  ;;  %p2840_p11 = scmp.ne.s32.totalorder %s3549_s0, %s2839_s1  ;;  %s2843_s24 = sshll.u32 %s2913_s21, 4  ;;  %s2844_s24 = int_to_ptr.vmem [resolvable:$false] %s2843_s24 }
0x10dc   : > { %2667 = vmatprep.subr.mxu0 %v2472_v26  ;;  %s2845_s20 = scalar_lea.vmem %s2844_s24, 512  ;;  %p2846_p0 = scmp.lt.s32.totalorder %s3549_s0, %s2844_s24 }
0x10dd   : > { %2668 = vmatpush3.msra.mxu0 %v2472_v26  ;;  %p2841_p12 = pnand %p2840_p11, %p3024_p5  ;;  %p2847_p1 = scmp.lt.s32.totalorder %s2845_s20, %s2839_s1 }
0x10de   : > { %2669 = vmatprep.subr.mxu0 %v2471_v52 }
0x10df   : > { %2670 = vmatpush3.msra.mxu0 %v2471_v52  ;;  %p2842_p13 = pneg %p2841_p12  ;;  %p2848_p2 = por %p2847_p1, %p2846_p0 }
0x10e1   : > { %p2849_p3 = pnand %p2848_p2, %p2842_p13 }
0x1141   : > { %v2123_v43 = vpop.permute.xlu1 %2122  ;;  %v2143_v56 = vpop.permute.xlu0 %2142 }
0x1142   : > { %v2128_v57 = vadd.f32 %v2123_v43, %v2108_v46 }
0x1144   : > { %v2148_v59 = vadd.f32 %v2143_v56, %v2128_v57 }
0x1145   : > { %v2125_v7 = vpop.permute.xlu1 %2124  ;;  %v2163_v9 = vpop.permute.xlu0 %2162 }
0x1146   : > { %v2168_v12 = vadd.f32 %v2163_v9, %v2148_v59  ;;  %v2129_v14 = vadd.f32 %v2125_v7, %v2109_v13 }
0x1148   : > { %v2180_v60 = vadd.f32 %v2178_v10, %v2168_v12 }
0x1149   : > { %v2145_v2 = vpop.permute.xlu1 %2144 }
0x114a   : > { %v2196_v0 = vmul.f32 %v2194_v49, %v2180_v60  ;;  %v2149_v15 = vadd.f32 %v2145_v2, %v2129_v14 }
0x114c   : > { %v2198_v62 = vsel %vm602_vm4, %v2196_v0, 0.0 }
0x114d   : > { %v2165_v63 = vpop.permute.xlu1 %2164  ;;  %2199 = vadd.xlane.f32.xlu0 %v2198_v62 }
0x114e   : > { %v2169_v17 = vadd.f32 %v2165_v63, %v2149_v15 }
0x1150   : > { %v2181_v4 = vadd.f32 %v2179_v55, %v2169_v17 }
0x1152   : > { %v2197_v1 = vmul.f32 %v2195_v11, %v2181_v4 }
0x1154   : > { %v2201_v18 = vsel %vm602_vm4, %v2197_v1, 0.0 }
0x1155   : > { %2202 = vadd.xlane.f32.xlu1 %v2201_v18 }
0x11d6   : > { %v2200_v51 = vpop.xlane.xlu0 %2199 }
0x11d7   : > { %v2204_v19 = vmul.f32 0.03125, %v2200_v51 }
0x11d9   : > { %v2206_v20 = vsub.f32 %v2196_v0, %v2204_v19 }
0x11db   : > { %v2208_v54 = vmul.f32 %v2206_v20, %v2206_v20 }
0x11dd   : > { %v2210_v21 = vsel %vm602_vm4, %v2208_v54, 0.0 }
0x11de   : > { %v2203_v22 = vpop.xlane.xlu1 %2202  ;;  %2211 = vadd.xlane.f32.xlu0 %v2210_v21 }
0x11df   : > { %v2205_v23 = vmul.f32 0.03125, %v2203_v22 }
0x11e1   : > { %v2207_v3 = vsub.f32 %v2197_v1, %v2205_v23 }
0x11e3   : > { %v2209_v24 = vmul.f32 %v2207_v3, %v2207_v3 }
0x11e5   : > { %v2213_v61 = vsel %vm602_vm4, %v2209_v24, 0.0 }
0x11e6   : > { %2214 = vadd.xlane.f32.xlu0 %v2213_v61 }
0x1267   : > { %v2212_v27 = vpop.xlane.xlu0 %2211 }
0x1268   : > { %v2216_v28 = vmul.f32 0.03125, %v2212_v27 }
0x126a   : > { %v2218_v50 = vadd.f32 1e-05, %v2216_v28 }
0x126c   : > { %2835 = vrsqrt.f32 %v2218_v50 }
0x126f   : > { %v2215_v29 = vpop.xlane.xlu0 %2214 }
0x1270   : > { %v2217_v30 = vmul.f32 0.03125, %v2215_v29 }
0x1272   : > { %v2219_v31 = vadd.f32 1e-05, %v2217_v30 }
0x1274   : > { %2837 = vrsqrt.f32 %v2219_v31 }
0x1279   : > { %v2836_v32 = vpop.eup %2835 }
0x127a   : > { %v2222_v33 = vmul.f32 %v2836_v32, %v2206_v20 }
0x127c   : > { %2671 = vmatprep.mubr.msk.f32.mxu0 %vm602_vm4, %v2222_v33 }
0x1281   : > { %v2838_v34 = vpop.eup %2837 }
0x1282   : > { %v2223_v35 = vmul.f32 %v2838_v34, %v2207_v3 }
0x1284   : > { %2672 = vmatmul.mubr.msk.f32.vlgmr.msra.gmra.mxu0 %vm602_vm4, %v2223_v35 }
0x1344   : > { %v2673_v53 = vpop.f32.mrf.mxu0 }
0x1345   : > { %v2315_v48 = vadd.f32 %v2673_v53, %v2476_v36 }
0x1346   : > { %v2309_v37 = vpop.f32.mrf.mxu0 }
0x1347   : > { %v2319_v38 = vadd.f32 %v2315_v48, %v3291_v6  ;;  %v2310_v39 = vadd.f32 %v2476_v36, %v2309_v37 }
0x1349   : > { %2321 = vst.msk [vmem:[%s433_s23 + $0x8] sm:$0xff] %vm441_vm0, %v2319_v38  ;;  %v2318_v40 = vadd.f32 %v2310_v39, %v3294_v8 }
0x134b   : > { %2320 = vst.msk [vmem:[%s433_s23] sm:$0xff] %vm441_vm0, %v2318_v40 }
0x134c   : > { %2852 = shalt.err (!%p2849_p3)
}
0x134d   : > { %s2853_s15 = scalar_lea.hbm %s3547_s30, 256  ;;  %s2857_s16 = scalar_lea.hbm %s3607_s13, 512 }
0x134e   : > { %p2854_p4 = scmp.ne.s32.totalorder %s3547_s30, %s2853_s15  ;;  %p2858_p9 = scmp.lt.s32.totalorder %s3547_s30, %s3607_s13 }
0x134f   : > { %p2859_p10 = scmp.lt.s32.totalorder %s2857_s16, %s2853_s15 }
0x1350   : > { %p2855_p7 = pnand %p2854_p4, %p3024_p5 }
0x1351   : > { %p2860_p11 = por %p2859_p10, %p2858_p9 }
0x1352   : > { %p2856_p8 = pneg %p2855_p7 }
0x1354   : > { %p2861_p12 = pnand %p2860_p11, %p2856_p8 }
0x1356   : > { %2864 = shalt.err (!%p2861_p12)
}
0x1357   : > { %s2914_s1 = smov 128   ;;  %s2915_s24 = smov 8  }
0x1358   : > { %2686 = dma.vmem_to_hbm [thread:$0]  (%p3024_p5), %s3549_s0, 256, %s3547_s30, %s3554_s29, %s2914_s1, %s2914_s1, %s2915_s24  }
0x1359 PF: > { %p2692_p13 = scmp.ge.s32.totalorder %s2899_s28, 2  ;;  %s2351_s20 = sand.u32 1, %s2887_s25  }
0x135a   : > { %s2352_s15 = scalar_lea.sflag [#allocation3], %s2351_s20 }
0x135b   : > { %p2689_p0 = pnand %p2692_p13, %p3028_p6 }
0x135d   : > { %p2690_p1 = pneg %p2689_p0 }
0x135f   : > { %2882 = dma.done.wait (%p2690_p1), %s2352_s15, 256  }
0x1360   : > { %2884 = vsyncadd (%p2690_p1), %s2352_s15, 4294967040  ;;  %s3627_s23 = sld [smem:[#allocation5_spill]]  ;;  %p23_p2 = scmp.ge.s32.totalorder %s3011_s14, 4  }
0x1361   : > { %s3628_s25 = smov %s2891_s26  ;;  %s3629_s26 = smov %s2895_s27 }
0x1362   : > { %s3631_s28 = smov %s3011_s14  ;;  %25 = sbr.rel (!%p23_p2) target bundleno = 6 (0x6), region = 119 }
0x1366   : > { %s3630_s27 = smov %s3627_s23 }
0x1367   :  { %2357 = vsyncpa [#allocation3], 1 }
0x1368   :  { %2359 = vsyncpa [#allocation3 + $0x1], 1 }

</bundles_post_ra>
